<compile_context>
chip_gen: v5e
topology: v5e:2x2
jax: 0.10.0
libtpu: 0.0.40
codegen_flags: <defaults>
</compile_context>

<pallas_src>
import jax
import jax.numpy as jnp
from jax import lax
from jax.experimental import pallas as pl
from jax.experimental.pallas import tpu as pltpu

BN_EPS = 1e-5


# ---------------------------------------------------------------------------
# align_corners=True 1-D bilinear interpolation matrix (row-stochastic).
# Matches F.interpolate(mode='bilinear', align_corners=True) along one axis.
# ---------------------------------------------------------------------------
def _interp_matrix(out_size, in_size):
    if out_size == in_size:
        return jnp.eye(in_size, dtype=jnp.float32)
    if in_size == 1:
        return jnp.ones((out_size, 1), dtype=jnp.float32)
    if out_size == 1:
        src = jnp.zeros((1,), dtype=jnp.float32)
    else:
        src = jnp.arange(out_size, dtype=jnp.float32) * (in_size - 1) / (out_size - 1)
    lo = jnp.clip(jnp.floor(src).astype(jnp.int32), 0, in_size - 2)
    hi = lo + 1
    w_hi = src - lo.astype(jnp.float32)
    w_lo = 1.0 - w_hi
    return (w_lo[:, None] * jax.nn.one_hot(lo, in_size, dtype=jnp.float32)
            + w_hi[:, None] * jax.nn.one_hot(hi, in_size, dtype=jnp.float32))


def _block_diag(mats):
    rows = sum(m.shape[0] for m in mats)
    cols = sum(m.shape[1] for m in mats)
    out = jnp.zeros((rows, cols), jnp.float32)
    r = c = 0
    for m in mats:
        out = out.at[r:r + m.shape[0], c:c + m.shape[1]].set(m)
        r += m.shape[0]
        c += m.shape[1]
    return out


# ---------------------------------------------------------------------------
# Single fused kernel.
# group_meta (static): tuple of (branch_channel_tuple, hw_in, needs_upsample).
# Ref order: gb (D, 2*n_branches+2) f32, then per group:
#   [x_b (N*C_b, hw_in) f32 for each branch], W_big (nb*N*D, N*sumC) bf16,
#   (Rt (hw_in, hw_out) bf16 if needs_upsample)], then out (N*D, hw_out) f32.
# ---------------------------------------------------------------------------
def _make_decoder_kernel(group_meta, batch, depth, hw_out):
    def kernel(*refs):
        it = iter(refs)
        gb_ref = next(it)
        groups = []
        for (chans, hw_in, needs_up) in group_meta:
            x_refs = [next(it) for _ in chans]
            w_ref = next(it)
            rt_ref = next(it) if needs_up else None
            groups.append((x_refs, w_ref, rt_ref, chans, hw_in, needs_up))
        o_ref = next(it)

        def rep(v):  # tile a (D,1) per-channel vector to (N*D,1), image-major
            return v if batch == 1 else jnp.concatenate([v] * batch, axis=0)

        col = 0
        bias_tot = jnp.zeros((depth, 1), jnp.float32)  # per-channel consts, added once
        first = True

        for (x_refs, w_ref, rt_ref, chans, hw_in, needs_up) in groups:
            nb = len(chans)
            # ReLU in f32 (v5e has no bf16 VALU), sublane-concat every (image, branch)
            # channel block, single bf16 cast, ONE conv matmul per group on the MXU.
            pieces = [jnp.maximum(xr[...], 0.0) for xr in x_refs]
            x_big = pieces[0] if nb == 1 else jnp.concatenate(pieces, axis=0)
            z = jnp.dot(w_ref[...], x_big.astype(jnp.bfloat16),
                        preferred_element_type=jnp.float32)   # (nb*N*D, hw_in) f32

            # one-pass train-BN stats (per branch channel), folded into scale/bias
            rs = jnp.sum(z, axis=1, keepdims=True)             # (nb*N*D, 1)
            rss = jnp.sum(z * z, axis=1, keepdims=True)
            inv_m = 1.0 / float(batch * hw_in)

            comb = [None] * batch
            for b in range(nb):
                s1 = jnp.zeros((depth, 1), jnp.float32)
                s2 = jnp.zeros((depth, 1), jnp.float32)
                for n in range(batch):
                    r0 = (b * batch + n) * depth
                    s1 = s1 + rs[r0:r0 + depth]
                    s2 = s2 + rss[r0:r0 + depth]
                mean = s1 * inv_m
                var = s2 * inv_m - mean * mean                 # biased train-mode var
                g = gb_ref[:, col:col + 1]                     # clamped branch weight
                bt = gb_ref[:, col + 1:col + 2]                # already folded in wrapper
                col += 2
                scale = g * lax.rsqrt(var + BN_EPS)
                bias_tot = bias_tot + (bt - mean * scale)
                # apply per-channel scale BEFORE the (row-stochastic) upsample; it commutes
                for n in range(batch):
                    r0 = (b * batch + n) * depth
                    contrib = scale * z[r0:r0 + depth]
                    comb[n] = contrib if comb[n] is None else comb[n] + contrib
            comb_all = comb[0] if batch == 1 else jnp.concatenate(comb, axis=0)

            # bilinear upsample (align_corners=True) as one bf16 MXU matmul for all images
            if needs_up:
                up = jnp.dot(comb_all.astype(jnp.bfloat16), rt_ref[...],
                             preferred_element_type=jnp.float32)   # (N*D, hw_out)
            else:
                up = comb_all

            if first:
                o_ref[...] = up
                first = False
            else:
                o_ref[...] = o_ref[...] + up

        # final train-mode BatchNorm: stash the biased map in o_ref, then rescale in place
        fg = gb_ref[:, col:col + 1]
        fb = gb_ref[:, col + 1:col + 2]
        x = o_ref[...] + rep(bias_tot)
        o_ref[...] = x
        rs = jnp.sum(x, axis=1, keepdims=True)                 # (N*D, 1)
        rss = jnp.sum(x * x, axis=1, keepdims=True)
        s1 = jnp.zeros((depth, 1), jnp.float32)
        s2 = jnp.zeros((depth, 1), jnp.float32)
        for n in range(batch):
            s1 = s1 + rs[n * depth:(n + 1) * depth]
            s2 = s2 + rss[n * depth:(n + 1) * depth]
        inv_m = 1.0 / float(batch * hw_out)
        mean = s1 * inv_m
        var = s2 * inv_m - mean * mean
        fscale = fg * lax.rsqrt(var + BN_EPS)
        fbias = fb - mean * fscale
        o_ref[...] = o_ref[...] * rep(fscale) + rep(fbias)

    return kernel


# ---------------------------------------------------------------------------
# Parameter setup (deterministic, in-script) and full forward.
# ---------------------------------------------------------------------------
def init_decoder_params(key, depth, down_channels, up_channels):
    n_levels = len(down_channels)
    keys = jax.random.split(key, 2 * n_levels)
    down_w, up_w = [], []
    for i, c in enumerate(down_channels):
        down_w.append(jax.random.normal(keys[2 * i], (depth, c), jnp.float32) / jnp.sqrt(c))
    for i, c in enumerate(up_channels):
        up_w.append(jax.random.normal(keys[2 * i + 1], (depth, c), jnp.float32) / jnp.sqrt(c))
    ones = jnp.ones((depth,), jnp.float32)
    zeros = jnp.zeros((depth,), jnp.float32)
    return {
        'down_w': down_w, 'up_w': up_w,
        'down_gamma': [ones] * n_levels, 'down_beta': [zeros] * n_levels,
        'up_gamma': [ones] * n_levels, 'up_beta': [zeros] * n_levels,
        'bn_gamma': ones, 'bn_beta': zeros,
        '_weight_': jnp.ones((n_levels, 2), jnp.float32),   # nn.Parameter(torch.ones(L, 2))
    }


def decoder_forward(params, down_feats, up_feats, noise_key):
    """down_feats / up_feats: lists of NCHW arrays. Returns NCHW (N, depth, H, W)."""
    depth = params['bn_gamma'].shape[0]
    n_levels = len(down_feats)
    assert len(up_feats) == n_levels

    # self.weight = clamp(_weight_ + randn_like(_weight_) * 0.1, 0, 2)
    noise = jax.random.normal(noise_key, params['_weight_'].shape, jnp.float32) * 0.1
    weight = jnp.clip(params['_weight_'] + noise, 0.0, 2.0)

    batch, _, h_out, w_out = down_feats[-1].shape   # output size from last down map
    hw_out = h_out * w_out

    group_meta = []
    inputs = [None]        # slot 0 = packed gamma/beta table
    in_specs = [None]
    gb_cols = []

    def spec2d(r, c):
        return pl.BlockSpec((r, c), lambda i: (0, 0))

    def add_group(branches, h, w):
        # branches: list of (feat NCHW, conv_w (D,C), gamma (D,), beta (D,), w_scalar)
        hw = h * w
        needs_up = not (h == h_out and w == w_out)
        chans = []
        wblocks = []
        for (feat, conv_w, gamma, beta, w_scalar) in branches:
            nb_, c = feat.shape[0], feat.shape[1]
            chans.append(c)
            x2d = feat.reshape(nb_ * c, hw)                 # free reshape, stays f32
            inputs.append(x2d)
            in_specs.append(spec2d(nb_ * c, hw))
            # image-batched block-diagonal conv weight for this branch
            wblocks.append(jnp.kron(jnp.eye(batch, dtype=jnp.float32), conv_w))
            # fold the clamped branch weight into the per-branch BN affine
            gb_cols.append(w_scalar * gamma)
            gb_cols.append(w_scalar * beta)
        w_big = _block_diag(wblocks).astype(jnp.bfloat16)   # (nb*N*D, N*sumC)
        inputs.append(w_big)
        in_specs.append(spec2d(w_big.shape[0], w_big.shape[1]))
        if needs_up:
            # TODO(synk): for large maps use separable Rh/Rw interpolation + hw_out grid
            # tiling (dense kron is the first VMEM blow-up on v7x's 64 MiB budget).
            rt = jnp.kron(_interp_matrix(h_out, h), _interp_matrix(w_out, w)).T
            inputs.append(rt.astype(jnp.bfloat16))
            in_specs.append(spec2d(hw, hw_out))
        group_meta.append((tuple(chans), hw, needs_up))

    for idx in range(n_levels):
        d_feat, u_feat = down_feats[idx], up_feats[idx]
        d_br = (d_feat, params['down_w'][idx], params['down_gamma'][idx],
                params['down_beta'][idx], weight[idx, 0])
        u_br = (u_feat, params['up_w'][idx], params['up_gamma'][idx],
                params['up_beta'][idx], weight[idx, 1])
        if d_feat.shape[2:] == u_feat.shape[2:]:
            add_group([d_br, u_br], d_feat.shape[2], d_feat.shape[3])
        else:
            add_group([d_br], d_feat.shape[2], d_feat.shape[3])
            add_group([u_br], u_feat.shape[2], u_feat.shape[3])

    gb_cols.append(params['bn_gamma'])
    gb_cols.append(params['bn_beta'])
    gb = jnp.stack(gb_cols, axis=1).astype(jnp.float32)     # (D, 2*n_branches+2)
    inputs[0] = gb
    in_specs[0] = spec2d(depth, gb.shape[1])

    kernel = _make_decoder_kernel(tuple(group_meta), batch, depth, hw_out)
    out = pl.pallas_call(
        kernel,
        out_shape=jax.ShapeDtypeStruct((batch * depth, hw_out), jnp.float32),
        grid=(1,),
        in_specs=in_specs,
        out_specs=pl.BlockSpec((batch * depth, hw_out), lambda i: (0, 0)),
        compiler_params=pltpu.CompilerParams(dimension_semantics=("arbitrary",)),
    )(*inputs)
    return out.reshape(batch, depth, h_out, w_out)


if __name__ == "__main__":
    key = jax.random.PRNGKey(0)
    k_param, k_noise, k_d0, k_d1, k_u0, k_u1 = jax.random.split(key, 6)

    depth = 16
    down_channels = [8, 16]
    up_channels = [8, 16]

    # NCHW feature maps (like the PyTorch module); down_feats[-1] sets the 16x16 output.
    down_feats = [
        jax.random.normal(k_d0, (2, down_channels[0], 8, 8), jnp.float32),
        jax.random.normal(k_d1, (2, down_channels[1], 16, 16), jnp.float32),
    ]
    up_feats = [
        jax.random.normal(k_u0, (2, up_channels[0], 8, 8), jnp.float32),
        jax.random.normal(k_u1, (2, up_channels[1], 16, 16), jnp.float32),
    ]

    params = init_decoder_params(k_param, depth, down_channels, up_channels)
    out = jax.jit(decoder_forward)(params, down_feats, up_feats, k_noise)
    out = jax.block_until_ready(out)
    assert out.shape == (2, depth, 16, 16), out.shape
    assert bool(jnp.all(jnp.isfinite(out)))
    print("KERNEL_OK")
</pallas_src>

<mosaic_0001>
module attributes {stable_mosaic.version = 11 : i64} {
  func.func @kernel(%arg0: i32, %arg1: memref<16x10xf32, #tpu.memory_space<vmem>>, %arg2: memref<16x64xf32, #tpu.memory_space<vmem>>, %arg3: memref<16x64xf32, #tpu.memory_space<vmem>>, %arg4: memref<64x32xbf16, #tpu.memory_space<vmem>>, %arg5: memref<64x256xbf16, #tpu.memory_space<vmem>>, %arg6: memref<32x256xf32, #tpu.memory_space<vmem>>, %arg7: memref<32x256xf32, #tpu.memory_space<vmem>>, %arg8: memref<64x64xbf16, #tpu.memory_space<vmem>>, %arg9: memref<32x256xf32, #tpu.memory_space<vmem>>) attributes {dimension_semantics = [#tpu.dimension_semantics<arbitrary>], iteration_bounds = array<i64: 1>, scalar_prefetch = 0 : i64, scratch_operands = 0 : i64, tpu.core_type = #tpu.core_type<tc>, window_params = [{pipeline_mode = #tpu.pipeline_mode<synchronous>, transform_indices = @transform_0, window_bounds = array<i64: 16, 10>}, {pipeline_mode = #tpu.pipeline_mode<synchronous>, transform_indices = @transform_1, window_bounds = array<i64: 16, 64>}, {pipeline_mode = #tpu.pipeline_mode<synchronous>, transform_indices = @transform_2, window_bounds = array<i64: 16, 64>}, {pipeline_mode = #tpu.pipeline_mode<synchronous>, transform_indices = @transform_3, window_bounds = array<i64: 64, 32>}, {pipeline_mode = #tpu.pipeline_mode<synchronous>, transform_indices = @transform_4, window_bounds = array<i64: 64, 256>}, {pipeline_mode = #tpu.pipeline_mode<synchronous>, transform_indices = @transform_5, window_bounds = array<i64: 32, 256>}, {pipeline_mode = #tpu.pipeline_mode<synchronous>, transform_indices = @transform_6, window_bounds = array<i64: 32, 256>}, {pipeline_mode = #tpu.pipeline_mode<synchronous>, transform_indices = @transform_7, window_bounds = array<i64: 64, 64>}, {pipeline_mode = #tpu.pipeline_mode<synchronous>, transform_indices = @transform_8, window_bounds = array<i64: 32, 256>}]} {
    %cst = arith.constant 0.000000e+00 : f32
    %0 = vector.broadcast %cst : f32 to vector<16x1xf32>
    %c0 = arith.constant 0 : index
    %c0_0 = arith.constant 0 : index
    %1 = vector.load %arg2[%c0, %c0_0] : memref<16x64xf32, #tpu.memory_space<vmem>>, vector<16x64xf32>
    %cst_1 = arith.constant 0.000000e+00 : f32
    %2 = vector.broadcast %cst_1 : f32 to vector<16x64xf32>
    %3 = arith.maximumf %1, %2 : vector<16x64xf32>
    %c0_2 = arith.constant 0 : index
    %c0_3 = arith.constant 0 : index
    %4 = vector.load %arg3[%c0_2, %c0_3] : memref<16x64xf32, #tpu.memory_space<vmem>>, vector<16x64xf32>
    %cst_4 = arith.constant 0.000000e+00 : f32
    %5 = vector.broadcast %cst_4 : f32 to vector<16x64xf32>
    %6 = arith.maximumf %4, %5 : vector<16x64xf32>
    %7 = tpu.concatenate %3, %6 in 0 : vector<16x64xf32>, vector<16x64xf32> -> vector<32x64xf32>
    %c0_5 = arith.constant 0 : index
    %c0_6 = arith.constant 0 : index
    %8 = vector.load %arg4[%c0_5, %c0_6] : memref<64x32xbf16, #tpu.memory_space<vmem>>, vector<64x32xbf16>
    %9 = arith.truncf %7 : vector<32x64xf32> to vector<32x64xbf16>
    %cst_7 = arith.constant dense<0.000000e+00> : vector<64x64xf32>
    %10 = tpu.matmul %8, %9, %cst_7 {dimension_numbers = #tpu.dot_dimension_numbers<[1], [0], [0], [1], [0, 0, 1, 1], [], []>} : vector<64x32xbf16>, vector<32x64xbf16>, vector<64x64xf32> -> vector<64x64xf32>
    %cst_8 = arith.constant dense<0.000000e+00> : vector<64xf32>
    %11 = vector.multi_reduction <add>, %10, %cst_8 [1] : vector<64x64xf32> to vector<64xf32>
    %12 = vector.shape_cast %11 : vector<64xf32> to vector<64x1xf32>
    %13 = arith.mulf %10, %10 : vector<64x64xf32>
    %cst_9 = arith.constant dense<0.000000e+00> : vector<64xf32>
    %14 = vector.multi_reduction <add>, %13, %cst_9 [1] : vector<64x64xf32> to vector<64xf32>
    %15 = vector.shape_cast %14 : vector<64xf32> to vector<64x1xf32>
    %cst_10 = arith.constant 0.000000e+00 : f32
    %16 = vector.broadcast %cst_10 : f32 to vector<16x1xf32>
    %cst_11 = arith.constant 0.000000e+00 : f32
    %17 = vector.broadcast %cst_11 : f32 to vector<16x1xf32>
    %18 = vector.extract_strided_slice %12 {offsets = [0, 0], sizes = [16, 1], strides = [1, 1]} : vector<64x1xf32> to vector<16x1xf32>
    %19 = arith.addf %16, %18 : vector<16x1xf32>
    %20 = vector.extract_strided_slice %15 {offsets = [0, 0], sizes = [16, 1], strides = [1, 1]} : vector<64x1xf32> to vector<16x1xf32>
    %21 = arith.addf %17, %20 : vector<16x1xf32>
    %22 = vector.extract_strided_slice %12 {offsets = [16, 0], sizes = [16, 1], strides = [1, 1]} : vector<64x1xf32> to vector<16x1xf32>
    %23 = arith.addf %19, %22 : vector<16x1xf32>
    %24 = vector.extract_strided_slice %15 {offsets = [16, 0], sizes = [16, 1], strides = [1, 1]} : vector<64x1xf32> to vector<16x1xf32>
    %25 = arith.addf %21, %24 : vector<16x1xf32>
    %cst_12 = arith.constant 7.812500e-03 : f32
    %26 = vector.broadcast %cst_12 : f32 to vector<16x1xf32>
    %27 = arith.mulf %23, %26 : vector<16x1xf32>
    %cst_13 = arith.constant 7.812500e-03 : f32
    %28 = vector.broadcast %cst_13 : f32 to vector<16x1xf32>
    %29 = arith.mulf %25, %28 : vector<16x1xf32>
    %30 = arith.mulf %27, %27 : vector<16x1xf32>
    %31 = arith.subf %29, %30 : vector<16x1xf32>
    %c0_14 = arith.constant 0 : index
    %c0_15 = arith.constant 0 : index
    %32 = vector.load %arg1[%c0_14, %c0_15] : memref<16x10xf32, #tpu.memory_space<vmem>>, vector<16x1xf32>
    %c0_16 = arith.constant 0 : index
    %c1 = arith.constant 1 : index
    %33 = vector.load %arg1[%c0_16, %c1] : memref<16x10xf32, #tpu.memory_space<vmem>>, vector<16x1xf32>
    %cst_17 = arith.constant 9.99999974E-6 : f32
    %34 = vector.broadcast %cst_17 : f32 to vector<16x1xf32>
    %35 = arith.addf %31, %34 : vector<16x1xf32>
    %36 = math.rsqrt %35 : vector<16x1xf32>
    %37 = arith.mulf %32, %36 : vector<16x1xf32>
    %38 = arith.mulf %27, %37 : vector<16x1xf32>
    %39 = arith.subf %33, %38 : vector<16x1xf32>
    %40 = arith.addf %0, %39 : vector<16x1xf32>
    %41 = vector.extract_strided_slice %10 {offsets = [0, 0], sizes = [16, 64], strides = [1, 1]} : vector<64x64xf32> to vector<16x64xf32>
    %42 = vector.broadcast %37 : vector<16x1xf32> to vector<16x64xf32>
    %43 = arith.mulf %42, %41 : vector<16x64xf32>
    %44 = vector.extract_strided_slice %10 {offsets = [16, 0], sizes = [16, 64], strides = [1, 1]} : vector<64x64xf32> to vector<16x64xf32>
    %45 = vector.broadcast %37 : vector<16x1xf32> to vector<16x64xf32>
    %46 = arith.mulf %45, %44 : vector<16x64xf32>
    %cst_18 = arith.constant 0.000000e+00 : f32
    %47 = vector.broadcast %cst_18 : f32 to vector<16x1xf32>
    %cst_19 = arith.constant 0.000000e+00 : f32
    %48 = vector.broadcast %cst_19 : f32 to vector<16x1xf32>
    %49 = vector.extract_strided_slice %12 {offsets = [32, 0], sizes = [16, 1], strides = [1, 1]} : vector<64x1xf32> to vector<16x1xf32>
    %50 = arith.addf %47, %49 : vector<16x1xf32>
    %51 = vector.extract_strided_slice %15 {offsets = [32, 0], sizes = [16, 1], strides = [1, 1]} : vector<64x1xf32> to vector<16x1xf32>
    %52 = arith.addf %48, %51 : vector<16x1xf32>
    %53 = vector.extract_strided_slice %12 {offsets = [48, 0], sizes = [16, 1], strides = [1, 1]} : vector<64x1xf32> to vector<16x1xf32>
    %54 = arith.addf %50, %53 : vector<16x1xf32>
    %55 = vector.extract_strided_slice %15 {offsets = [48, 0], sizes = [16, 1], strides = [1, 1]} : vector<64x1xf32> to vector<16x1xf32>
    %56 = arith.addf %52, %55 : vector<16x1xf32>
    %cst_20 = arith.constant 7.812500e-03 : f32
    %57 = vector.broadcast %cst_20 : f32 to vector<16x1xf32>
    %58 = arith.mulf %54, %57 : vector<16x1xf32>
    %cst_21 = arith.constant 7.812500e-03 : f32
    %59 = vector.broadcast %cst_21 : f32 to vector<16x1xf32>
    %60 = arith.mulf %56, %59 : vector<16x1xf32>
    %61 = arith.mulf %58, %58 : vector<16x1xf32>
    %62 = arith.subf %60, %61 : vector<16x1xf32>
    %c0_22 = arith.constant 0 : index
    %c2 = arith.constant 2 : index
    %63 = vector.load %arg1[%c0_22, %c2] : memref<16x10xf32, #tpu.memory_space<vmem>>, vector<16x1xf32>
    %c0_23 = arith.constant 0 : index
    %c3 = arith.constant 3 : index
    %64 = vector.load %arg1[%c0_23, %c3] : memref<16x10xf32, #tpu.memory_space<vmem>>, vector<16x1xf32>
    %cst_24 = arith.constant 9.99999974E-6 : f32
    %65 = vector.broadcast %cst_24 : f32 to vector<16x1xf32>
    %66 = arith.addf %62, %65 : vector<16x1xf32>
    %67 = math.rsqrt %66 : vector<16x1xf32>
    %68 = arith.mulf %63, %67 : vector<16x1xf32>
    %69 = arith.mulf %58, %68 : vector<16x1xf32>
    %70 = arith.subf %64, %69 : vector<16x1xf32>
    %71 = arith.addf %40, %70 : vector<16x1xf32>
    %72 = vector.extract_strided_slice %10 {offsets = [32, 0], sizes = [16, 64], strides = [1, 1]} : vector<64x64xf32> to vector<16x64xf32>
    %73 = vector.broadcast %68 : vector<16x1xf32> to vector<16x64xf32>
    %74 = arith.mulf %73, %72 : vector<16x64xf32>
    %75 = arith.addf %43, %74 : vector<16x64xf32>
    %76 = vector.extract_strided_slice %10 {offsets = [48, 0], sizes = [16, 64], strides = [1, 1]} : vector<64x64xf32> to vector<16x64xf32>
    %77 = vector.broadcast %68 : vector<16x1xf32> to vector<16x64xf32>
    %78 = arith.mulf %77, %76 : vector<16x64xf32>
    %79 = arith.addf %46, %78 : vector<16x64xf32>
    %80 = tpu.concatenate %75, %79 in 0 : vector<16x64xf32>, vector<16x64xf32> -> vector<32x64xf32>
    %81 = arith.truncf %80 : vector<32x64xf32> to vector<32x64xbf16>
    %c0_25 = arith.constant 0 : index
    %c0_26 = arith.constant 0 : index
    %82 = vector.load %arg5[%c0_25, %c0_26] : memref<64x256xbf16, #tpu.memory_space<vmem>>, vector<64x256xbf16>
    %cst_27 = arith.constant dense<0.000000e+00> : vector<32x256xf32>
    %83 = tpu.matmul %81, %82, %cst_27 {dimension_numbers = #tpu.dot_dimension_numbers<[1], [0], [0], [1], [0, 0, 1, 1], [], []>} : vector<32x64xbf16>, vector<64x256xbf16>, vector<32x256xf32> -> vector<32x256xf32>
    %c0_28 = arith.constant 0 : index
    %c0_29 = arith.constant 0 : index
    %84 = vector.load %arg9[%c0_28, %c0_29] : memref<32x256xf32, #tpu.memory_space<vmem>>, vector<32x256xf32>
    tpu.vector_store %arg9[%c0_28, %c0_29], %83 {strides = array<i32>} : memref<32x256xf32, #tpu.memory_space<vmem>>, vector<32x256xf32>,
    %c0_30 = arith.constant 0 : index
    %c0_31 = arith.constant 0 : index
    %85 = vector.load %arg6[%c0_30, %c0_31] : memref<32x256xf32, #tpu.memory_space<vmem>>, vector<32x256xf32>
    %cst_32 = arith.constant 0.000000e+00 : f32
    %86 = vector.broadcast %cst_32 : f32 to vector<32x256xf32>
    %87 = arith.maximumf %85, %86 : vector<32x256xf32>
    %c0_33 = arith.constant 0 : index
    %c0_34 = arith.constant 0 : index
    %88 = vector.load %arg7[%c0_33, %c0_34] : memref<32x256xf32, #tpu.memory_space<vmem>>, vector<32x256xf32>
    %cst_35 = arith.constant 0.000000e+00 : f32
    %89 = vector.broadcast %cst_35 : f32 to vector<32x256xf32>
    %90 = arith.maximumf %88, %89 : vector<32x256xf32>
    %91 = tpu.concatenate %87, %90 in 0 : vector<32x256xf32>, vector<32x256xf32> -> vector<64x256xf32>
    %c0_36 = arith.constant 0 : index
    %c0_37 = arith.constant 0 : index
    %92 = vector.load %arg8[%c0_36, %c0_37] : memref<64x64xbf16, #tpu.memory_space<vmem>>, vector<64x64xbf16>
    %93 = arith.truncf %91 : vector<64x256xf32> to vector<64x256xbf16>
    %cst_38 = arith.constant dense<0.000000e+00> : vector<64x256xf32>
    %94 = tpu.matmul %92, %93, %cst_38 {dimension_numbers = #tpu.dot_dimension_numbers<[1], [0], [0], [1], [0, 0, 1, 1], [], []>} : vector<64x64xbf16>, vector<64x256xbf16>, vector<64x256xf32> -> vector<64x256xf32>
    %cst_39 = arith.constant dense<0.000000e+00> : vector<64xf32>
    %95 = vector.multi_reduction <add>, %94, %cst_39 [1] : vector<64x256xf32> to vector<64xf32>
    %96 = vector.shape_cast %95 : vector<64xf32> to vector<64x1xf32>
    %97 = arith.mulf %94, %94 : vector<64x256xf32>
    %cst_40 = arith.constant dense<0.000000e+00> : vector<64xf32>
    %98 = vector.multi_reduction <add>, %97, %cst_40 [1] : vector<64x256xf32> to vector<64xf32>
    %99 = vector.shape_cast %98 : vector<64xf32> to vector<64x1xf32>
    %cst_41 = arith.constant 0.000000e+00 : f32
    %100 = vector.broadcast %cst_41 : f32 to vector<16x1xf32>
    %cst_42 = arith.constant 0.000000e+00 : f32
    %101 = vector.broadcast %cst_42 : f32 to vector<16x1xf32>
    %102 = vector.extract_strided_slice %96 {offsets = [0, 0], sizes = [16, 1], strides = [1, 1]} : vector<64x1xf32> to vector<16x1xf32>
    %103 = arith.addf %100, %102 : vector<16x1xf32>
    %104 = vector.extract_strided_slice %99 {offsets = [0, 0], sizes = [16, 1], strides = [1, 1]} : vector<64x1xf32> to vector<16x1xf32>
    %105 = arith.addf %101, %104 : vector<16x1xf32>
    %106 = vector.extract_strided_slice %96 {offsets = [16, 0], sizes = [16, 1], strides = [1, 1]} : vector<64x1xf32> to vector<16x1xf32>
    %107 = arith.addf %103, %106 : vector<16x1xf32>
    %108 = vector.extract_strided_slice %99 {offsets = [16, 0], sizes = [16, 1], strides = [1, 1]} : vector<64x1xf32> to vector<16x1xf32>
    %109 = arith.addf %105, %108 : vector<16x1xf32>
    %cst_43 = arith.constant 0.001953125 : f32
    %110 = vector.broadcast %cst_43 : f32 to vector<16x1xf32>
    %111 = arith.mulf %107, %110 : vector<16x1xf32>
    %cst_44 = arith.constant 0.001953125 : f32
    %112 = vector.broadcast %cst_44 : f32 to vector<16x1xf32>
    %113 = arith.mulf %109, %112 : vector<16x1xf32>
    %114 = arith.mulf %111, %111 : vector<16x1xf32>
    %115 = arith.subf %113, %114 : vector<16x1xf32>
    %c0_45 = arith.constant 0 : index
    %c4 = arith.constant 4 : index
    %116 = vector.load %arg1[%c0_45, %c4] : memref<16x10xf32, #tpu.memory_space<vmem>>, vector<16x1xf32>
    %c0_46 = arith.constant 0 : index
    %c5 = arith.constant 5 : index
    %117 = vector.load %arg1[%c0_46, %c5] : memref<16x10xf32, #tpu.memory_space<vmem>>, vector<16x1xf32>
    %cst_47 = arith.constant 9.99999974E-6 : f32
    %118 = vector.broadcast %cst_47 : f32 to vector<16x1xf32>
    %119 = arith.addf %115, %118 : vector<16x1xf32>
    %120 = math.rsqrt %119 : vector<16x1xf32>
    %121 = arith.mulf %116, %120 : vector<16x1xf32>
    %122 = arith.mulf %111, %121 : vector<16x1xf32>
    %123 = arith.subf %117, %122 : vector<16x1xf32>
    %124 = arith.addf %71, %123 : vector<16x1xf32>
    %125 = vector.extract_strided_slice %94 {offsets = [0, 0], sizes = [16, 256], strides = [1, 1]} : vector<64x256xf32> to vector<16x256xf32>
    %126 = vector.broadcast %121 : vector<16x1xf32> to vector<16x256xf32>
    %127 = arith.mulf %126, %125 : vector<16x256xf32>
    %128 = vector.extract_strided_slice %94 {offsets = [16, 0], sizes = [16, 256], strides = [1, 1]} : vector<64x256xf32> to vector<16x256xf32>
    %129 = vector.broadcast %121 : vector<16x1xf32> to vector<16x256xf32>
    %130 = arith.mulf %129, %128 : vector<16x256xf32>
    %cst_48 = arith.constant 0.000000e+00 : f32
    %131 = vector.broadcast %cst_48 : f32 to vector<16x1xf32>
    %cst_49 = arith.constant 0.000000e+00 : f32
    %132 = vector.broadcast %cst_49 : f32 to vector<16x1xf32>
    %133 = vector.extract_strided_slice %96 {offsets = [32, 0], sizes = [16, 1], strides = [1, 1]} : vector<64x1xf32> to vector<16x1xf32>
    %134 = arith.addf %131, %133 : vector<16x1xf32>
    %135 = vector.extract_strided_slice %99 {offsets = [32, 0], sizes = [16, 1], strides = [1, 1]} : vector<64x1xf32> to vector<16x1xf32>
    %136 = arith.addf %132, %135 : vector<16x1xf32>
    %137 = vector.extract_strided_slice %96 {offsets = [48, 0], sizes = [16, 1], strides = [1, 1]} : vector<64x1xf32> to vector<16x1xf32>
    %138 = arith.addf %134, %137 : vector<16x1xf32>
    %139 = vector.extract_strided_slice %99 {offsets = [48, 0], sizes = [16, 1], strides = [1, 1]} : vector<64x1xf32> to vector<16x1xf32>
    %140 = arith.addf %136, %139 : vector<16x1xf32>
    %cst_50 = arith.constant 0.001953125 : f32
    %141 = vector.broadcast %cst_50 : f32 to vector<16x1xf32>
    %142 = arith.mulf %138, %141 : vector<16x1xf32>
    %cst_51 = arith.constant 0.001953125 : f32
    %143 = vector.broadcast %cst_51 : f32 to vector<16x1xf32>
    %144 = arith.mulf %140, %143 : vector<16x1xf32>
    %145 = arith.mulf %142, %142 : vector<16x1xf32>
    %146 = arith.subf %144, %145 : vector<16x1xf32>
    %c0_52 = arith.constant 0 : index
    %c6 = arith.constant 6 : index
    %147 = vector.load %arg1[%c0_52, %c6] : memref<16x10xf32, #tpu.memory_space<vmem>>, vector<16x1xf32>
    %c0_53 = arith.constant 0 : index
    %c7 = arith.constant 7 : index
    %148 = vector.load %arg1[%c0_53, %c7] : memref<16x10xf32, #tpu.memory_space<vmem>>, vector<16x1xf32>
    %cst_54 = arith.constant 9.99999974E-6 : f32
    %149 = vector.broadcast %cst_54 : f32 to vector<16x1xf32>
    %150 = arith.addf %146, %149 : vector<16x1xf32>
    %151 = math.rsqrt %150 : vector<16x1xf32>
    %152 = arith.mulf %147, %151 : vector<16x1xf32>
    %153 = arith.mulf %142, %152 : vector<16x1xf32>
    %154 = arith.subf %148, %153 : vector<16x1xf32>
    %155 = arith.addf %124, %154 : vector<16x1xf32>
    %156 = vector.extract_strided_slice %94 {offsets = [32, 0], sizes = [16, 256], strides = [1, 1]} : vector<64x256xf32> to vector<16x256xf32>
    %157 = vector.broadcast %152 : vector<16x1xf32> to vector<16x256xf32>
    %158 = arith.mulf %157, %156 : vector<16x256xf32>
    %159 = arith.addf %127, %158 : vector<16x256xf32>
    %160 = vector.extract_strided_slice %94 {offsets = [48, 0], sizes = [16, 256], strides = [1, 1]} : vector<64x256xf32> to vector<16x256xf32>
    %161 = vector.broadcast %152 : vector<16x1xf32> to vector<16x256xf32>
    %162 = arith.mulf %161, %160 : vector<16x256xf32>
    %163 = arith.addf %130, %162 : vector<16x256xf32>
    %164 = tpu.concatenate %159, %163 in 0 : vector<16x256xf32>, vector<16x256xf32> -> vector<32x256xf32>
    %c0_55 = arith.constant 0 : index
    %c0_56 = arith.constant 0 : index
    %165 = vector.load %arg9[%c0_55, %c0_56] : memref<32x256xf32, #tpu.memory_space<vmem>>, vector<32x256xf32>
    %166 = arith.addf %165, %164 : vector<32x256xf32>
    %c0_57 = arith.constant 0 : index
    %c0_58 = arith.constant 0 : index
    %167 = vector.load %arg9[%c0_57, %c0_58] : memref<32x256xf32, #tpu.memory_space<vmem>>, vector<32x256xf32>
    tpu.vector_store %arg9[%c0_57, %c0_58], %166 {strides = array<i32>} : memref<32x256xf32, #tpu.memory_space<vmem>>, vector<32x256xf32>,
    %c0_59 = arith.constant 0 : index
    %c8 = arith.constant 8 : index
    %168 = vector.load %arg1[%c0_59, %c8] : memref<16x10xf32, #tpu.memory_space<vmem>>, vector<16x1xf32>
    %c0_60 = arith.constant 0 : index
    %c9 = arith.constant 9 : index
    %169 = vector.load %arg1[%c0_60, %c9] : memref<16x10xf32, #tpu.memory_space<vmem>>, vector<16x1xf32>
    %c0_61 = arith.constant 0 : index
    %c0_62 = arith.constant 0 : index
    %170 = vector.load %arg9[%c0_61, %c0_62] : memref<32x256xf32, #tpu.memory_space<vmem>>, vector<32x256xf32>
    %171 = tpu.concatenate %155, %155 in 0 : vector<16x1xf32>, vector<16x1xf32> -> vector<32x1xf32>
    %172 = vector.broadcast %171 : vector<32x1xf32> to vector<32x256xf32>
    %173 = arith.addf %170, %172 : vector<32x256xf32>
    %c0_63 = arith.constant 0 : index
    %c0_64 = arith.constant 0 : index
    %174 = vector.load %arg9[%c0_63, %c0_64] : memref<32x256xf32, #tpu.memory_space<vmem>>, vector<32x256xf32>
    tpu.vector_store %arg9[%c0_63, %c0_64], %173 {strides = array<i32>} : memref<32x256xf32, #tpu.memory_space<vmem>>, vector<32x256xf32>,
    %cst_65 = arith.constant dense<0.000000e+00> : vector<32xf32>
    %175 = vector.multi_reduction <add>, %173, %cst_65 [1] : vector<32x256xf32> to vector<32xf32>
    %176 = vector.shape_cast %175 : vector<32xf32> to vector<32x1xf32>
    %177 = arith.mulf %173, %173 : vector<32x256xf32>
    %cst_66 = arith.constant dense<0.000000e+00> : vector<32xf32>
    %178 = vector.multi_reduction <add>, %177, %cst_66 [1] : vector<32x256xf32> to vector<32xf32>
    %179 = vector.shape_cast %178 : vector<32xf32> to vector<32x1xf32>
    %cst_67 = arith.constant 0.000000e+00 : f32
    %180 = vector.broadcast %cst_67 : f32 to vector<16x1xf32>
    %cst_68 = arith.constant 0.000000e+00 : f32
    %181 = vector.broadcast %cst_68 : f32 to vector<16x1xf32>
    %182 = vector.extract_strided_slice %176 {offsets = [0, 0], sizes = [16, 1], strides = [1, 1]} : vector<32x1xf32> to vector<16x1xf32>
    %183 = arith.addf %180, %182 : vector<16x1xf32>
    %184 = vector.extract_strided_slice %179 {offsets = [0, 0], sizes = [16, 1], strides = [1, 1]} : vector<32x1xf32> to vector<16x1xf32>
    %185 = arith.addf %181, %184 : vector<16x1xf32>
    %186 = vector.extract_strided_slice %176 {offsets = [16, 0], sizes = [16, 1], strides = [1, 1]} : vector<32x1xf32> to vector<16x1xf32>
    %187 = arith.addf %183, %186 : vector<16x1xf32>
    %188 = vector.extract_strided_slice %179 {offsets = [16, 0], sizes = [16, 1], strides = [1, 1]} : vector<32x1xf32> to vector<16x1xf32>
    %189 = arith.addf %185, %188 : vector<16x1xf32>
    %cst_69 = arith.constant 0.001953125 : f32
    %190 = vector.broadcast %cst_69 : f32 to vector<16x1xf32>
    %191 = arith.mulf %187, %190 : vector<16x1xf32>
    %cst_70 = arith.constant 0.001953125 : f32
    %192 = vector.broadcast %cst_70 : f32 to vector<16x1xf32>
    %193 = arith.mulf %189, %192 : vector<16x1xf32>
    %194 = arith.mulf %191, %191 : vector<16x1xf32>
    %195 = arith.subf %193, %194 : vector<16x1xf32>
    %cst_71 = arith.constant 9.99999974E-6 : f32
    %196 = vector.broadcast %cst_71 : f32 to vector<16x1xf32>
    %197 = arith.addf %195, %196 : vector<16x1xf32>
    %198 = math.rsqrt %197 : vector<16x1xf32>
    %199 = arith.mulf %168, %198 : vector<16x1xf32>
    %200 = arith.mulf %191, %199 : vector<16x1xf32>
    %201 = arith.subf %169, %200 : vector<16x1xf32>
    %c0_72 = arith.constant 0 : index
    %c0_73 = arith.constant 0 : index
    %202 = vector.load %arg9[%c0_72, %c0_73] : memref<32x256xf32, #tpu.memory_space<vmem>>, vector<32x256xf32>
    %203 = tpu.concatenate %199, %199 in 0 : vector<16x1xf32>, vector<16x1xf32> -> vector<32x1xf32>
    %204 = vector.broadcast %203 : vector<32x1xf32> to vector<32x256xf32>
    %205 = arith.mulf %202, %204 : vector<32x256xf32>
    %206 = tpu.concatenate %201, %201 in 0 : vector<16x1xf32>, vector<16x1xf32> -> vector<32x1xf32>
    %207 = vector.broadcast %206 : vector<32x1xf32> to vector<32x256xf32>
    %208 = arith.addf %205, %207 : vector<32x256xf32>
    %c0_74 = arith.constant 0 : index
    %c0_75 = arith.constant 0 : index
    %209 = vector.load %arg9[%c0_74, %c0_75] : memref<32x256xf32, #tpu.memory_space<vmem>>, vector<32x256xf32>
    tpu.vector_store %arg9[%c0_74, %c0_75], %208 {strides = array<i32>} : memref<32x256xf32, #tpu.memory_space<vmem>>, vector<32x256xf32>,
    return
  }
  func.func @transform_0(%arg0: i32) -> (i32, i32) {
    %c0_i32 = arith.constant 0 : i32
    %c0_i32_0 = arith.constant 0 : i32
    %c0_i32_1 = arith.constant 0 : i32
    return %c0_i32, %c0_i32_0 : i32, i32
  }
  func.func @transform_1(%arg0: i32) -> (i32, i32) {
    %c0_i32 = arith.constant 0 : i32
    %c0_i32_0 = arith.constant 0 : i32
    %c0_i32_1 = arith.constant 0 : i32
    return %c0_i32, %c0_i32_0 : i32, i32
  }
  func.func @transform_2(%arg0: i32) -> (i32, i32) {
    %c0_i32 = arith.constant 0 : i32
    %c0_i32_0 = arith.constant 0 : i32
    %c0_i32_1 = arith.constant 0 : i32
    return %c0_i32, %c0_i32_0 : i32, i32
  }
  func.func @transform_3(%arg0: i32) -> (i32, i32) {
    %c0_i32 = arith.constant 0 : i32
    %c0_i32_0 = arith.constant 0 : i32
    %c0_i32_1 = arith.constant 0 : i32
    return %c0_i32, %c0_i32_0 : i32, i32
  }
  func.func @transform_4(%arg0: i32) -> (i32, i32) {
    %c0_i32 = arith.constant 0 : i32
    %c0_i32_0 = arith.constant 0 : i32
    %c0_i32_1 = arith.constant 0 : i32
    return %c0_i32, %c0_i32_0 : i32, i32
  }
  func.func @transform_5(%arg0: i32) -> (i32, i32) {
    %c0_i32 = arith.constant 0 : i32
    %c0_i32_0 = arith.constant 0 : i32
    %c0_i32_1 = arith.constant 0 : i32
    return %c0_i32, %c0_i32_0 : i32, i32
  }
  func.func @transform_6(%arg0: i32) -> (i32, i32) {
    %c0_i32 = arith.constant 0 : i32
    %c0_i32_0 = arith.constant 0 : i32
    %c0_i32_1 = arith.constant 0 : i32
    return %c0_i32, %c0_i32_0 : i32, i32
  }
  func.func @transform_7(%arg0: i32) -> (i32, i32) {
    %c0_i32 = arith.constant 0 : i32
    %c0_i32_0 = arith.constant 0 : i32
    %c0_i32_1 = arith.constant 0 : i32
    return %c0_i32, %c0_i32_0 : i32, i32
  }
  func.func @transform_8(%arg0: i32) -> (i32, i32) {
    %c0_i32 = arith.constant 0 : i32
    %c0_i32_0 = arith.constant 0 : i32
    %c0_i32_1 = arith.constant 0 : i32
    return %c0_i32, %c0_i32_0 : i32, i32
  }
}

</mosaic_0001>

<bundles_post_ra>
// kernel: decoder_forward.1
= control target key start
LH: loop header
LB: loop body
LE: loop exit
PB: predicated region body
PF: predicated region fallthrough
CT: control target
= control target key end

     0   :  { %vm68_vm0 = vcmask 261120   ;;  %vm110_vm1 = vcmask 523264   ;;  %s1135_s21 = smov 1   ;;  %s1139_s16 = smov 124   ;;  %s1624_s2 = inlined_call_operand.vmem [shape: f32[16,64], index: 2, kind: input, shape index: {}]   ;;  %s1625_s1 = inlined_call_operand.vmem [shape: f32[16,64], index: 1, kind: input, shape index: {}]   ;;  %s1626_s3 = inlined_call_operand.vmem [shape: bf16[64,32], index: 3, kind: input, shape index: {}]   ;;  %s1627_s6 = inlined_call_operand.vmem [shape: f32[32,256], index: 6, kind: input, shape index: {}]   ;;  %s1628_s5 = inlined_call_operand.vmem [shape: f32[32,256], index: 5, kind: input, shape index: {}]   ;;  %s1629_s7 = inlined_call_operand.vmem [shape: bf16[64,64], index: 7, kind: input, shape index: {}]   ;;  %s1630_s0 = inlined_call_operand.vmem [shape: f32[16,10], index: 0, kind: input, shape index: {}]   ;;  %s1631_s4 = inlined_call_operand.vmem [shape: bf16[64,256], index: 4, kind: input, shape index: {}]   ;;  %s1632_s8 = inlined_call_operand.vmem [shape: f32[32,256], index: 8, kind: output, shape index: {}]  }
   0x1   :  { %v34_v0 = vld [vmem:[%s1624_s2] sm:$0xff]  ;;  %v35_v1 = vld [vmem:[%s1624_s2 + $0x8] sm:$0xff]  ;;  %v1073_v12 = vld [vmem:[%s1626_s3 + $0x10] sm:$0xff]  ;;  %s1140_s17 = smov 122  }
   0x2   :  { %v30_v2 = vld [vmem:[%s1625_s1] sm:$0xff]  ;;  %v36_v3 = vmax.f32 %v34_v0, 0.0  ;;  %v37_v4 = vmax.f32 %v35_v1, 0.0  ;;  %v31_v5 = vld [vmem:[%s1625_s1 + $0x8] sm:$0xff]  ;;  %v1074_v13 = vld [vmem:[%s1626_s3 + $0x18] sm:$0xff] }
   0x3   :  { %v32_v6 = vmax.f32 %v30_v2, 0.0  ;;  %v33_v7 = vmax.f32 %v31_v5, 0.0  ;;  %v1071_v10 = vld [vmem:[%s1626_s3] sm:$0xff]  ;;  %v1072_v11 = vld [vmem:[%s1626_s3 + $0x8] sm:$0xff]  ;;  %v441_v15 = vld [vmem:[%s1627_s6 + $0x30] sm:$0xff] }
   0x4   :  { %v47_v8 = vpack.c.bf16 %v37_v4, %v36_v3  ;;  %v439_v14 = vld [vmem:[%s1627_s6 + $0x20] sm:$0xff]  ;;  %v449_v17 = vmax.f32 %v441_v15, 0.0  ;;  %v437_v20 = vld [vmem:[%s1627_s6 + $0x10] sm:$0xff]  ;;  %v440_v24 = vld [vmem:[%s1627_s6 + $0x28] sm:$0xff] }
   0x5   :  { %v46_v9 = vpack.c.bf16 %v33_v7, %v32_v6  ;;  %v447_v16 = vmax.f32 %v439_v14, 0.0  ;;  %v435_v19 = vld [vmem:[%s1627_s6] sm:$0xff]  ;;  %v445_v22 = vmax.f32 %v437_v20, 0.0  ;;  %v442_v25 = vld [vmem:[%s1627_s6 + $0x38] sm:$0xff]  ;;  %v448_v29 = vmax.f32 %v440_v24, 0.0  ;;  %v425_v32 = vld [vmem:[%s1628_s5 + $0x30] sm:$0xff] }
   0x6   :  { %87 = vmatpush.bf16.msra.mxu0 %v47_v8  ;;  %v443_v21 = vmax.f32 %v435_v19, 0.0  ;;  %v450_v30 = vmax.f32 %v442_v25, 0.0  ;;  %v423_v31 = vld [vmem:[%s1628_s5 + $0x20] sm:$0xff]  ;;  %v433_v35 = vmax.f32 %v425_v32, 0.0  ;;  %v436_v37 = vld [vmem:[%s1627_s6 + $0x8] sm:$0xff]  ;;  %v438_v38 = vld [vmem:[%s1627_s6 + $0x18] sm:$0xff] }
   0x7   :  { %v465_v18 = vpack.c.bf16 %v449_v17, %v447_v16  ;;  %v431_v34 = vmax.f32 %v423_v31, 0.0  ;;  %v444_v40 = vmax.f32 %v436_v37, 0.0  ;;  %v446_v41 = vmax.f32 %v438_v38, 0.0  ;;  %v419_v42 = vld [vmem:[%s1628_s5] sm:$0xff]  ;;  %v421_v43 = vld [vmem:[%s1628_s5 + $0x10] sm:$0xff]  ;;  %v424_v48 = vld [vmem:[%s1628_s5 + $0x28] sm:$0xff] }
   0x8   :  { %v463_v28 = vpack.c.bf16 %v445_v22, %v443_v21  ;;  %v466_v36 = vpack.c.bf16 %v450_v30, %v448_v29  ;;  %v427_v45 = vmax.f32 %v419_v42, 0.0  ;;  %v429_v46 = vmax.f32 %v421_v43, 0.0  ;;  %v426_v49 = vld [vmem:[%s1628_s5 + $0x38] sm:$0xff]  ;;  %v1083_v55 = vld [vmem:[%s1629_s7] sm:$0xff]  ;;  %v420_v56 = vld [vmem:[%s1628_s5 + $0x8] sm:$0xff] }
   0x9   :  { %503 = vmatpush.bf16.msra.mxu3 %v465_v18  ;;  %v461_v39 = vpack.c.bf16 %v433_v35, %v431_v34  ;;  %v464_v44 = vpack.c.bf16 %v446_v41, %v444_v40  ;;  %v432_v52 = vmax.f32 %v424_v48, 0.0  ;;  %v434_v53 = vmax.f32 %v426_v49, 0.0  ;;  %v422_v57 = vld [vmem:[%s1628_s5 + $0x18] sm:$0xff]  ;;  %v1084_v6 = vld [vmem:[%s1629_s7 + $0x8] sm:$0xff] }
   0xa   :  { %88 = vmatpush.bf16.msra.mxu0 %v46_v9  ;;  %532 = vmatpush.bf16.msra.mxu1 %v466_v36  ;;  %v459_v51 = vpack.c.bf16 %v429_v46, %v427_v45  ;;  %v428_v59 = vmax.f32 %v420_v56, 0.0  ;;  %v430_v60 = vmax.f32 %v422_v57, 0.0  ;;  %v1086_v22 = vld [vmem:[%s1629_s7 + $0x18] sm:$0xff]  ;;  %v1133_v31 = vmov 0  }
   0xb   :  { %v462_v54 = vpack.c.bf16 %v434_v53, %v432_v52  ;;  %1098 = vset.pattern.permute.xlu1 %v1133_v31  ;;  %1099 = vset.pattern.permute.xlu2 %v1133_v31 }
   0xc   :  { %v460_v61 = vpack.c.bf16 %v430_v60, %v428_v59 }
   0xd   :  { %1007 = vmatmul.msk.bf16.vlgmr.msra.gmra.mxu0 %vm68_vm0, %v1071_v10  ;;  %504 = vmatpush.bf16.msra.mxu3 %v463_v28 }
   0xe   :  { %533 = vmatpush.bf16.msra.mxu1 %v464_v44 }
  0x11   :  { %505 = vmatpush.bf16.msra.mxu3 %v461_v39 }
  0x12   :  { %534 = vmatpush.bf16.msra.mxu1 %v462_v54 }
  0x15   :  { %506 = vmatpush.bf16.msra.mxu3 %v459_v51 }
  0x16   :  { %535 = vmatpush.bf16.msra.mxu1 %v460_v61  ;;  %v1134_v61 = vmov 2  }
  0x17   :  { %1100 = vset.pattern.permute.xlu0 %v1134_v61 }
  0x18   :  { %1063 = vmatmul.msk.bf16.vlgmr.msra.gmra.mxu3 %vm110_vm1, %v1083_v55 }
  0x19   :  { %1067 = vmatmul.msk.bf16.vlgmr.msra.gmra.mxu1 %vm110_vm1, %v1083_v55 }
  0x1d   :  { %1008 = vmatmul.msk.bf16.gmra.mxu0 %vm68_vm0, %v1072_v11 }
  0x28   :  { %1064 = vmatmul.msk.bf16.gmra.mxu3 %vm110_vm1, %v1084_v6 }
  0x29   :  { %1068 = vmatmul.msk.bf16.gmra.mxu1 %vm110_vm1, %v1084_v6 }
  0x2d   :  { %1009 = vmatmul.msk.bf16.gmra.mxu0 %vm68_vm0, %v1073_v12 }
  0x3d   :  { %1010 = vmatmul.msk.bf16.gmra.mxu0 %vm68_vm0, %v1074_v13  ;;  %v1085_v13 = vld [vmem:[%s1629_s7 + $0x10] sm:$0xff] }
  0x3e   :  { %1065 = vmatmul.msk.bf16.gmra.mxu3 %vm110_vm1, %v1085_v13  ;;  %1069 = vmatmul.msk.bf16.gmra.mxu1 %vm110_vm1, %v1085_v13 }
  0x4e   :  { %1066 = vmatmul.msk.bf16.gmra.mxu3 %vm110_vm1, %v1086_v22  ;;  %1070 = vmatmul.msk.bf16.gmra.mxu1 %vm110_vm1, %v1086_v22 }
  0x8a   :  { %v1225_v23 = vpop.f32.mrf.mxu0 }
  0x8b   :  { %v111_v26 = vsel %vm110_vm1, %v1225_v23, 0.0  ;;  %v135_v27 = vmul.f32 %v1225_v23, %v1225_v23 }
  0x8c   :  { %112 = vadd.xlane.f32.xlu0 %v111_v26 }
  0x8d   :  { %v143_v33 = vsel %vm110_vm1, %v135_v27, 0.0 }
  0x8e   :  { %144 = vadd.xlane.f32.xlu2 %v143_v33 }
  0x92   :  { %v1256_v47 = vpop.f32.mrf.mxu0 }
  0x93   :  { %v114_v50 = vsel %vm110_vm1, %v1256_v47, 0.0  ;;  %v136_v58 = vmul.f32 %v1256_v47, %v1256_v47 }
  0x94   :  { %115 = vadd.xlane.f32.xlu0 %v114_v50 }
  0x95   :  { %v146_v63 = vsel %vm110_vm1, %v136_v58, 0.0 }
  0x96   :  { %v1339_v58 = vpop.f32.mrf.mxu1 }
  0x9a   :  { %v1278_v62 = vpop.f32.mrf.mxu0 }
  0x9b   :  { %v117_v0 = vsel %vm110_vm1, %v1278_v62, 0.0  ;;  %v137_v1 = vmul.f32 %v1278_v62, %v1278_v62  ;;  %v1337_v55 = vpop.f32.mrf.mxu3 }
  0x9c   :  { %147 = vadd.xlane.f32.xlu0 %v146_v63  ;;  %118 = vadd.xlane.f32.xlu1 %v117_v0  ;;  %v1344_v0 = vld [vmem:[%s1630_s0] sm:$0xff] }
  0x9d   :  { %v149_v3 = vsel %vm110_vm1, %v137_v1, 0.0 }
  0xa2   :  { %v1286_v2 = vpop.f32.mrf.mxu0 }
  0xa3   :  { %v138_v4 = vmul.f32 %v1286_v2, %v1286_v2  ;;  %v120_v8 = vsel %vm110_vm1, %v1286_v2, 0.0 }
  0xa4   :  { %150 = vadd.xlane.f32.xlu1 %v149_v3 }
  0xa5   :  { %v152_v5 = vsel %vm110_vm1, %v138_v4, 0.0 }
  0xa6   :  { %153 = vadd.xlane.f32.xlu2 %v152_v5 }
  0xaa   :  { %v1296_v7 = vpop.f32.mrf.mxu0 }
  0xab   :  { %v139_v9 = vmul.f32 %v1296_v7, %v1296_v7  ;;  %v123_v11 = vsel %vm110_vm1, %v1296_v7, 0.0 }
  0xac   :  { %121 = vadd.xlane.f32.xlu1 %v120_v8 }
  0xad   :  { %v155_v10 = vsel %vm110_vm1, %v139_v9, 0.0 }
  0xae   :  { %156 = vadd.xlane.f32.xlu0 %v155_v10  ;;  %124 = vadd.xlane.f32.xlu2 %v123_v11 }
  0xb2   :  { %v1306_v12 = vpop.f32.mrf.mxu0 }
  0xb3   :  { %v126_v14 = vsel %vm110_vm1, %v1306_v12, 0.0  ;;  %v140_v25 = vmul.f32 %v1306_v12, %v1306_v12 }
  0xb5   :  { %v158_v26 = vsel %vm110_vm1, %v140_v25, 0.0 }
  0xb6   :  { %127 = vadd.xlane.f32.xlu2 %v126_v14  ;;  %v1347_v14 = vpop.f32.mrf.mxu3 }
  0xba   :  { %v1314_v15 = vpop.f32.mrf.mxu0 }
  0xbb   :  { %v129_v16 = vsel %vm110_vm1, %v1314_v15, 0.0  ;;  %v141_v17 = vmul.f32 %v1314_v15, %v1314_v15 }
  0xbc   :  { %130 = vadd.xlane.f32.xlu0 %v129_v16  ;;  %v1349_v16 = vpop.f32.mrf.mxu1 }
  0xbd   :  { %v161_v18 = vsel %vm110_vm1, %v141_v17, 0.0 }
  0xbe   :  { %162 = vadd.xlane.f32.xlu2 %v161_v18 }
  0xc2   :  { %v1322_v19 = vpop.f32.mrf.mxu0 }
  0xc3   :  { %v142_v20 = vmul.f32 %v1322_v19, %v1322_v19  ;;  %v132_v21 = vsel %vm110_vm1, %v1322_v19, 0.0 }
  0xc4   :  { %133 = vadd.xlane.f32.xlu1 %v132_v21 }
  0xc5   :  { %v164_v24 = vsel %vm110_vm1, %v142_v20, 0.0 }
  0xc6   :  { %165 = vadd.xlane.f32.xlu0 %v164_v24 }
  0xcc   :  { %159 = vadd.xlane.f32.xlu1 %v158_v26 }
  0xff   :  { %v113_v27 = vpop.xlane.xlu0 %112 }
 0x101   :  { %v145_v29 = vpop.xlane.xlu2 %144 }
 0x107   :  { %v116_v32 = vpop.xlane.xlu0 %115 }
 0x10f   :  { %v119_v28 = vpop.xlane.xlu1 %118  ;;  %v148_v41 = vpop.xlane.xlu0 %147 }
 0x110   :  { %v171_v30 = vadd.f32 %v119_v28, %v113_v27  ;;  %v1356_v27 = vld [vmem:[%s1630_s0 + $0x8] sm:$0xff] }
 0x112   :  { %v175_v33 = vmul.f32 0.0078125, %v171_v30 }
 0x114   :  { %v179_v37 = vmul.f32 %v175_v33, %v175_v33 }
 0x117   :  { %v151_v34 = vpop.xlane.xlu1 %150 }
 0x118   :  { %v173_v35 = vadd.f32 %v151_v34, %v145_v29 }
 0x119   :  { %v154_v36 = vpop.xlane.xlu2 %153 }
 0x11a   :  { %v177_v38 = vmul.f32 0.0078125, %v173_v35  ;;  %v174_v43 = vadd.f32 %v154_v36, %v148_v41 }
 0x11c   :  { %v181_v39 = vsub.f32 %v177_v38, %v179_v37  ;;  %v178_v48 = vmul.f32 0.0078125, %v174_v43 }
 0x11e   :  { %v185_v40 = vadd.f32 1e-05, %v181_v39 }
 0x11f   :  { %v122_v42 = vpop.xlane.xlu1 %121 }
 0x120   :  { %1113 = vrsqrt.f32 %v185_v40  ;;  %v172_v44 = vadd.f32 %v122_v42, %v116_v32  ;;  %vm193_vm3 = vweird.f32 %v185_v40  ;;  %v1359_v32 = vpop.f32.mrf.mxu3 }
 0x121   :  { %v125_v45 = vpop.xlane.xlu2 %124  ;;  %v157_v53 = vpop.xlane.xlu0 %156 }
 0x122   :  { %v176_v46 = vmul.f32 0.0078125, %v172_v44 }
 0x124   :  { %v180_v49 = vmul.f32 %v176_v46, %v176_v46 }
 0x126   :  { %v1114_v50 = vpop.eup %1113  ;;  %v182_v51 = vsub.f32 %v178_v48, %v180_v49 }
 0x127   :  { %v188_v52 = vmul.f32 %v1114_v50, %v185_v40  ;;  %vm194_vm2 = vweird.f32 %v1114_v50 }
 0x128   :  { %v186_v54 = vadd.f32 1e-05, %v182_v51  ;;  %vm195_vm4 = vmor %vm193_vm3, %vm194_vm2 }
 0x129   :  { %v189_v56 = vmul.f32 %v1114_v50, %v188_v52  ;;  %v128_v57 = vpop.xlane.xlu2 %127 }
 0x12a   :  { %1115 = vrsqrt.f32 %v186_v54  ;;  %vm203_vm6 = vweird.f32 %v186_v54 }
 0x12b   :  { %v190_v59 = vmul.f32 0.5, %v189_v56 }
 0x12d   :  { %v191_v60 = vsub.f32 1.5, %v190_v59 }
 0x12f   :  { %v131_v63 = vpop.xlane.xlu0 %130  ;;  %v192_v1 = vmul.f32 %v1114_v50, %v191_v60 }
 0x130   :  { %v1116_v3 = vpop.eup %1115  ;;  %v241_v4 = vadd.f32 %v131_v63, %v125_v45 }
 0x131   :  { %v198_v5 = vmul.f32 %v1116_v3, %v186_v54  ;;  %v163_v6 = vpop.xlane.xlu2 %162  ;;  %v196_v8 = vsel %vm195_vm4, %v1114_v50, %v192_v1  ;;  %vm204_vm5 = vweird.f32 %v1116_v3  ;;  %v1365_v50 = vpop.f32.mrf.mxu3 }
 0x132   :  { %v245_v9 = vmul.f32 0.0078125, %v241_v4  ;;  %v243_v10 = vadd.f32 %v163_v6, %v157_v53  ;;  %v207_v11 = vmul.f32 %v196_v8, %v1344_v0  ;;  %vm205_vm7 = vmor %vm203_vm6, %vm204_vm5  ;;  %v557_v6 = vadd.f32 %v1339_v58, %v1337_v55 }
 0x133   :  { %v199_v13 = vmul.f32 %v1116_v3, %v198_v5 }
 0x134   :  { %v249_v17 = vmul.f32 %v245_v9, %v245_v9  ;;  %v247_v18 = vmul.f32 0.0078125, %v243_v10  ;;  %225 = vperm.xlu1 %1098, %v207_v11   ;;  %v1351_v20 = vmul.f32 %v207_v11, %v175_v33  ;;  %v1361_v33 = vpop.f32.mrf.mxu1 }
 0x135   :  { %v200_v21 = vmul.f32 0.5, %v199_v13 }
 0x136   :  { %v251_v22 = vsub.f32 %v247_v18, %v249_v17 }
 0x137   :  { %v201_v24 = vsub.f32 1.5, %v200_v21  ;;  %v134_v25 = vpop.xlane.xlu1 %133 }
 0x138   :  { %v253_v26 = vadd.f32 1e-05, %v251_v22  ;;  %v242_v29 = vadd.f32 %v134_v25, %v128_v57  ;;  %v563_v25 = vadd.f32 %v1361_v33, %v1359_v32 }
 0x139   :  { %v202_v28 = vmul.f32 %v1116_v3, %v201_v24  ;;  %v166_v36 = vpop.xlane.xlu0 %165  ;;  %v1372_v60 = vpop.f32.mrf.mxu3 }
 0x13a   :  { %1117 = vrsqrt.f32 %v253_v26  ;;  %v246_v35 = vmul.f32 0.0078125, %v242_v29  ;;  %vm261_vm9 = vweird.f32 %v253_v26  ;;  %v583_v29 = vmul.f32 %v1347_v14, %v1347_v14 }
 0x13b   :  { %v206_v30 = vsel %vm205_vm7, %v1116_v3, %v202_v28  ;;  %v586_v28 = vmul.f32 %v1361_v33, %v1361_v33 }
 0x13c   :  { %v208_v31 = vmul.f32 %v206_v30, %v1356_v27  ;;  %v250_v41 = vmul.f32 %v246_v35, %v246_v35  ;;  %v584_v30 = vmul.f32 %v1349_v16, %v1349_v16 }
 0x13e   :  { %v1363_v34 = vmul.f32 %v208_v31, %v176_v46  ;;  %230 = vperm.xlu2 %1099, %v208_v31   ;;  %v1367_v46 = vpop.f32.mrf.mxu1 }
 0x13f   :  { %v160_v37 = vpop.xlane.xlu1 %159  ;;  %v566_v11 = vadd.f32 %v1367_v46, %v1365_v50 }
 0x140   :  { %v1118_v38 = vpop.eup %1117  ;;  %v244_v39 = vadd.f32 %v166_v36, %v160_v37 }
 0x141   :  { %v256_v40 = vmul.f32 %v1118_v38, %v253_v26  ;;  %vm262_vm8 = vweird.f32 %v1118_v38  ;;  %v1379_v8 = vpop.f32.mrf.mxu3  ;;  %v585_v26 = vmul.f32 %v1359_v32, %v1359_v32 }
 0x142   :  { %v248_v42 = vmul.f32 0.0078125, %v244_v39  ;;  %vm263_vm10 = vmor %vm261_vm9, %vm262_vm8  ;;  %v591_v36 = vmul.f32 %v1379_v8, %v1379_v8 }
 0x143   :  { %v257_v43 = vmul.f32 %v1118_v38, %v256_v40  ;;  %v603_v31 = vadd.f32 %v586_v28, %v585_v26 }
 0x144   :  { %v252_v44 = vsub.f32 %v248_v42, %v250_v41  ;;  %v560_v41 = vadd.f32 %v1349_v16, %v1347_v14 }
 0x145   :  { %v258_v45 = vmul.f32 0.5, %v257_v43 }
 0x146   :  { %v254_v48 = vadd.f32 1e-05, %v252_v44  ;;  %1101 = vset.pattern.permute.xlu2 %v1134_v61  ;;  %v1374_v61 = vpop.f32.mrf.mxu1 }
 0x147   :  { %v259_v49 = vsub.f32 1.5, %v258_v45  ;;  %v590_v39 = vmul.f32 %v1374_v61, %v1374_v61  ;;  %v569_v45 = vadd.f32 %v1374_v61, %v1372_v60 }
 0x148   :  { %1119 = vrsqrt.f32 %v254_v48  ;;  %vm271_vm12 = vweird.f32 %v254_v48 }
 0x149   :  { %v260_v51 = vmul.f32 %v1118_v38, %v259_v49  ;;  %v1387_v13 = vpop.f32.mrf.mxu3 }
 0x14b   :  { %v264_v52 = vsel %vm263_vm10, %v1118_v38, %v260_v51  ;;  %v589_v38 = vmul.f32 %v1372_v60, %v1372_v60  ;;  %v1037_v51 = vld [vmem:[%s1631_s4 + $0x30] sm:$0xf] }
 0x14c   :  { %v275_v53 = vmul.f32 %v264_v52, %v1344_v0  ;;  %v1082_v52 = vld [vmem:[%s1631_s4 + $0x34] sm:$0xf0] }
 0x14d   :  { %v609_v42 = vadd.f32 %v590_v39, %v589_v38  ;;  %v1079_v38 = vld [vmem:[%s1631_s4 + $0x24] sm:$0xf]  ;;  %v1031_v39 = vld [vmem:[%s1631_s4 + $0x28] sm:$0xf0] }
 0x14e   :  { %v1120_v54 = vpop.eup %1119  ;;  %301 = vperm.xlu0 %1100, %v275_v53   ;;  %v1370_v56 = vmul.f32 %v275_v53, %v245_v9  ;;  %v1381_v9 = vpop.f32.mrf.mxu1  ;;  %v1038_v53 = vor.u32 %v1082_v52, %v1037_v51 }
 0x14f   :  { %v266_v57 = vmul.f32 %v1120_v54, %v254_v48  ;;  %vm272_vm11 = vweird.f32 %v1120_v54  ;;  %v572_v18 = vadd.f32 %v1381_v9, %v1379_v8  ;;  %v592_v37 = vmul.f32 %v1381_v9, %v1381_v9 }
 0x150   :  { %vm273_vm13 = vmor %vm271_vm12, %vm272_vm11  ;;  %377 = vmatpush.bf16.msra.mxu2 %v1038_v53 }
 0x151   :  { %v267_v59 = vmul.f32 %v1120_v54, %v266_v57  ;;  %v1393_v21 = vpop.f32.mrf.mxu3  ;;  %v612_v40 = vadd.f32 %v592_v37, %v591_v36  ;;  %v582_v57 = vmul.f32 %v1339_v58, %v1339_v58  ;;  %v1039_v36 = vld [vmem:[%s1631_s4 + $0x38] sm:$0xf0] }
 0x152   :  { %v595_v43 = vmul.f32 %v1393_v21, %v1393_v21 }
 0x153   :  { %v268_v63 = vmul.f32 0.5, %v267_v59  ;;  %v1029_v59 = vld [vmem:[%s1631_s4 + $0x20] sm:$0xf] }
 0x155   :  { %v269_v1 = vsub.f32 1.5, %v268_v63  ;;  %v1080_v63 = vld [vmem:[%s1631_s4 + $0x24] sm:$0xf0] }
 0x156   :  { %v1389_v17 = vpop.f32.mrf.mxu1 }
 0x157   :  { %v270_v3 = vmul.f32 %v1120_v54, %v269_v1  ;;  %v575_v49 = vadd.f32 %v1389_v17, %v1387_v13  ;;  %v1021_v1 = vld [vmem:[%s1631_s4 + $0x10] sm:$0xf] }
 0x159   :  { %v274_v4 = vsel %vm273_vm13, %v1120_v54, %v270_v3  ;;  %v581_v54 = vmul.f32 %v1337_v55, %v1337_v55  ;;  %v1030_v3 = vor.u32 %v1080_v63, %v1029_v59 }
 0x15a   :  { %v276_v5 = vmul.f32 %v274_v4, %v1356_v27  ;;  %v1078_v4 = vld [vmem:[%s1631_s4 + $0x14] sm:$0xf0] }
 0x15b   :  { %378 = vmatpush.bf16.msra.mxu2 %v1030_v3 }
 0x15c   :  { %306 = vperm.xlu2 %1101, %v276_v5   ;;  %v1383_v10 = vmul.f32 %v276_v5, %v246_v35  ;;  %v600_v35 = vadd.f32 %v584_v30, %v583_v29  ;;  %v597_v5 = vadd.f32 %v582_v57, %v581_v54  ;;  %v594_v29 = vmul.f32 %v1389_v17, %v1389_v17  ;;  %v1075_v54 = vld [vmem:[%s1631_s4 + $0x4] sm:$0xf]  ;;  %v1015_v57 = vld [vmem:[%s1631_s4 + $0x8] sm:$0xf0] }
 0x15d   :  { %v1018_v59 = vor.u32 %v1075_v54, %v1015_v57 }
 0x15e   :  { %558 = vadd.xlane.f32.xlu1 %v557_v6  ;;  %v1395_v22 = vpop.f32.mrf.mxu1  ;;  %v1022_v6 = vor.u32 %v1078_v4, %v1021_v1 }
 0x15f   :  { %v578_v24 = vadd.f32 %v1395_v22, %v1393_v21  ;;  %v596_v44 = vmul.f32 %v1395_v22, %v1395_v22 }
 0x160   :  { %379 = vmatpush.bf16.msra.mxu2 %v1022_v6 }
 0x161   :  { %v618_v48 = vadd.f32 %v596_v44, %v595_v43 }
 0x166   :  { %567 = vadd.xlane.f32.xlu1 %v566_v11  ;;  %v587_v11 = vmul.f32 %v1365_v50, %v1365_v50 }
 0x16e   :  { %573 = vadd.xlane.f32.xlu1 %v572_v18  ;;  %v588_v18 = vmul.f32 %v1367_v46, %v1367_v46 }
 0x170   :  { %v606_v28 = vadd.f32 %v588_v18, %v587_v11 }
 0x176   :  { %579 = vadd.xlane.f32.xlu1 %v578_v24  ;;  %v1013_v24 = vld [vmem:[%s1631_s4] sm:$0xf] }
 0x178   :  { %564 = vadd.xlane.f32.xlu0 %v563_v25  ;;  %v1076_v25 = vld [vmem:[%s1631_s4 + $0x4] sm:$0xf0] }
 0x179   :  { %v1014_v26 = vor.u32 %v1076_v25, %v1013_v24 }
 0x17b   :  { %380 = vmatpush.bf16.msra.mxu2 %v1014_v26 }
 0x17e   :  { %604 = vadd.xlane.f32.xlu1 %v603_v31 }
 0x180   :  { %601 = vadd.xlane.f32.xlu0 %v600_v35  ;;  %v1081_v35 = vld [vmem:[%s1631_s4 + $0x34] sm:$0xf] }
 0x181   :  { %v1042_v37 = vor.u32 %v1081_v35, %v1039_v36 }
 0x183   :  { %396 = vmatpush.bf16.msrb.mxu2 %v1042_v37 }
 0x185   :  { %561 = vadd.xlane.f32.xlu2 %v560_v41  ;;  %v1034_v41 = vor.u32 %v1079_v38, %v1031_v39 }
 0x186   :  { %613 = vadd.xlane.f32.xlu1 %v612_v40  ;;  %v1077_v40 = vld [vmem:[%s1631_s4 + $0x14] sm:$0xf] }
 0x187   :  { %397 = vmatpush.bf16.msrb.mxu2 %v1034_v41 }
 0x188   :  { %610 = vadd.xlane.f32.xlu0 %v609_v42  ;;  %v1023_v42 = vld [vmem:[%s1631_s4 + $0x18] sm:$0xf0]  ;;  %s1136_s4 = smov 126  }
 0x189   :  { %v1026_v44 = vor.u32 %v1077_v40, %v1023_v42 }
 0x18b   :  { %398 = vmatpush.bf16.msrb.mxu2 %v1026_v44 }
 0x18d   :  { %570 = vadd.xlane.f32.xlu2 %v569_v45 }
 0x18f   :  { %399 = vmatpush.bf16.msrb.mxu2 %v1018_v59 }
 0x190   :  { %619 = vadd.xlane.f32.xlu0 %v618_v48 }
 0x195   :  { %576 = vadd.xlane.f32.xlu2 %v575_v49 }
 0x198   :  { %v231_v31 = vpop.permute.xlu2 %230 }
 0x199   :  { %v234_v51 = vmul.f32 %v231_v31, %v1256_v47  ;;  %v236_v3 = vmul.f32 %v231_v31, %v1286_v2 }
 0x19d   :  { %598 = vadd.xlane.f32.xlu2 %v597_v5 }
 0x19f   :  { %281 = vrot.lane.b32.xlu1 %v1370_v56, %s1135_s21  ;;  %v593_v56 = vmul.f32 %v1387_v13, %v1387_v13 }
 0x1a1   :  { %v615_v30 = vadd.f32 %v594_v29, %v593_v56 }
 0x1a5   :  { %607 = vadd.xlane.f32.xlu2 %v606_v28 }
 0x1a6   :  { %v226_v45 = vpop.permute.xlu1 %225 }
 0x1a7   :  { %v233_v52 = vmul.f32 %v226_v45, %v1225_v23 }
 0x1ad   :  { %616 = vadd.xlane.f32.xlu2 %v615_v30 }
 0x1b6   :  { %v307_v43 = vpop.permute.xlu2 %306 }
 0x1b7   :  { %v310_v48 = vmul.f32 %v307_v43, %v1306_v12  ;;  %v314_v12 = vmul.f32 %v307_v43, %v1322_v19 }
 0x1b9   :  { %v312_v63 = vadd.f32 %v310_v48, %v234_v51  ;;  %v316_v6 = vadd.f32 %v314_v12, %v236_v3 }
 0x1c0   :  { %v302_v49 = vpop.permute.xlu0 %301 }
 0x1c1   :  { %v309_v53 = vmul.f32 %v302_v49, %v1296_v7  ;;  %v313_v23 = vmul.f32 %v302_v49, %v1314_v15  ;;  %v235_v7 = vmul.f32 %v226_v45, %v1278_v62 }
 0x1c3   :  { %v311_v1 = vadd.f32 %v309_v53, %v233_v52  ;;  %v315_v4 = vadd.f32 %v313_v23, %v235_v7 }
 0x1c5   :  { %283 = vrot.lane.b32.xlu2 %v1383_v10, %s1135_s21  ;;  %v317_v47 = vpack.c.bf16 %v312_v63, %v311_v1  ;;  %v318_v11 = vpack.c.bf16 %v316_v6, %v315_v4 }
 0x1c7   :  { %1043 = vmatmul.msk.bf16.vlgmr.msra.gmra.mxu2 %vm110_vm1, %v317_v47 }
 0x1d1   :  { %v559_v5 = vpop.xlane.xlu1 %558 }
 0x1d7   :  { %1044 = vmatmul.msk.bf16.gmra.mxu2 %vm110_vm1, %v318_v11 }
 0x1d9   :  { %v568_v18 = vpop.xlane.xlu1 %567 }
 0x1e1   :  { %v574_v24 = vpop.xlane.xlu1 %573 }
 0x1e7   :  { %1045 = vmatmul.msk.bf16.vlgmr.msrb.gmra.mxu2 %vm110_vm1, %v317_v47 }
 0x1e9   :  { %v580_v25 = vpop.xlane.xlu1 %579 }
 0x1ea   :  { %v708_v28 = vadd.f32 %v580_v25, %v574_v24 }
 0x1eb   :  { %v565_v10 = vpop.xlane.xlu0 %564 }
 0x1ec   :  { %v712_v56 = vmul.f32 0.001953125, %v708_v28  ;;  %v625_v40 = vadd.f32 %v565_v10, %v559_v5 }
 0x1ee   :  { %v716_v35 = vmul.f32 %v712_v56, %v712_v56  ;;  %v629_v41 = vmul.f32 0.001953125, %v625_v40 }
 0x1f0   :  { %v633_v48 = vmul.f32 %v629_v41, %v629_v41 }
 0x1f1   :  { %v605_v15 = vpop.xlane.xlu1 %604 }
 0x1f3   :  { %v602_v26 = vpop.xlane.xlu0 %601 }
 0x1f7   :  { %1046 = vmatmul.msk.bf16.gmra.mxu2 %vm110_vm1, %v318_v11 }
 0x1f8   :  { %v562_v62 = vpop.xlane.xlu2 %561 }
 0x1f9   :  { %v614_v29 = vpop.xlane.xlu1 %613  ;;  %v626_v45 = vadd.f32 %v568_v18, %v562_v62 }
 0x1fb   :  { %v611_v19 = vpop.xlane.xlu0 %610  ;;  %v630_v54 = vmul.f32 0.001953125, %v626_v45 }
 0x1fd   :  { %v634_v23 = vmul.f32 %v630_v54, %v630_v54 }
 0x200   :  { %v571_v2 = vpop.xlane.xlu2 %570 }
 0x203   :  { %v620_v30 = vpop.xlane.xlu0 %619 }
 0x204   :  { %v710_v31 = vadd.f32 %v620_v30, %v614_v29 }
 0x206   :  { %v714_v36 = vmul.f32 0.001953125, %v710_v31 }
 0x208   :  { %v718_v37 = vsub.f32 %v714_v36, %v716_v35  ;;  %v577_v38 = vpop.xlane.xlu2 %576 }
 0x209   :  { %v707_v7 = vadd.f32 %v577_v38, %v571_v2 }
 0x20a   :  { %v720_v39 = vadd.f32 1e-05, %v718_v37 }
 0x20b   :  { %v711_v18 = vmul.f32 0.001953125, %v707_v7 }
 0x20c   :  { %1121 = vrsqrt.f32 %v720_v39  ;;  %vm737_vm15 = vweird.f32 %v720_v39 }
 0x20d   :  { %v715_v28 = vmul.f32 %v711_v18, %v711_v18 }
 0x210   :  { %v599_v42 = vpop.xlane.xlu2 %598 }
 0x211   :  { %v627_v43 = vadd.f32 %v605_v15, %v599_v42  ;;  %v282_v30 = vpop.permute.xlu1 %281 }
 0x212   :  { %v1122_v44 = vpop.eup %1121  ;;  %v287_v38 = vsub.f32 %v1344_v0, %v282_v30 }
 0x213   :  { %v732_v49 = vmul.f32 %v1122_v44, %v720_v39  ;;  %v631_v51 = vmul.f32 0.001953125, %v627_v43  ;;  %vm738_vm14 = vweird.f32 %v1122_v44 }
 0x214   :  { %vm739_vm0 = vmor %vm737_vm15, %vm738_vm14 }
 0x215   :  { %v733_v52 = vmul.f32 %v1122_v44, %v732_v49  ;;  %v635_v53 = vsub.f32 %v631_v51, %v633_v48 }
 0x217   :  { %v734_v57 = vmul.f32 0.5, %v733_v52  ;;  %v639_v59 = vadd.f32 1e-05, %v635_v53 }
 0x218   :  { %v608_v63 = vpop.xlane.xlu2 %607 }
 0x219   :  { %v735_v1 = vsub.f32 1.5, %v734_v57  ;;  %1123 = vrsqrt.f32 %v639_v59  ;;  %v628_v47 = vadd.f32 %v608_v63, %v602_v26  ;;  %vm647_vm2 = vweird.f32 %v639_v59 }
 0x21b   :  { %v632_v12 = vmul.f32 0.001953125, %v628_v47  ;;  %v736_v3 = vmul.f32 %v1122_v44, %v735_v1 }
 0x21d   :  { %v636_v4 = vsub.f32 %v632_v12, %v634_v23  ;;  %v740_v5 = vsel %vm739_vm0, %v1122_v44, %v736_v3 }
 0x21e   :  { %v1504_v6 = vmul.f32 %v740_v5, %v1356_v27 }
 0x21f   :  { %v1124_v11 = vpop.eup %1123  ;;  %v640_v24 = vadd.f32 1e-05, %v636_v4  ;;  %v1138_v4 = vmov 6  }
 0x220   :  { %v642_v10 = vmul.f32 %v1124_v11, %v639_v59  ;;  %v617_v25 = vpop.xlane.xlu2 %616  ;;  %v744_v62 = vmul.f32 %v1504_v6, %v712_v56  ;;  %vm648_vm1 = vweird.f32 %v1124_v11  ;;  %1104 = vset.pattern.permute.xlu0 %v1138_v4 }
 0x221   :  { %1125 = vrsqrt.f32 %v640_v24  ;;  %v709_v26 = vadd.f32 %v617_v25, %v611_v19  ;;  %vm649_vm3 = vmor %vm647_vm2, %vm648_vm1  ;;  %vm657_vm5 = vweird.f32 %v640_v24 }
 0x222   :  { %v643_v15 = vmul.f32 %v1124_v11, %v642_v10  ;;  %749 = vrot.lane.b32.xlu2 %v744_v62, %s1135_s21  ;;  %v1141_v62 = vmov 1  }
 0x223   :  { %v713_v2 = vmul.f32 0.001953125, %v709_v26 }
 0x224   :  { %v644_v29 = vmul.f32 0.5, %v643_v15 }
 0x225   :  { %v717_v31 = vsub.f32 %v713_v2, %v715_v28 }
 0x226   :  { %v645_v35 = vsub.f32 1.5, %v644_v29 }
 0x227   :  { %v1126_v36 = vpop.eup %1125  ;;  %v719_v37 = vadd.f32 1e-05, %v717_v31 }
 0x228   :  { %v652_v39 = vmul.f32 %v1126_v36, %v640_v24  ;;  %v646_v40 = vmul.f32 %v1124_v11, %v645_v35  ;;  %vm658_vm4 = vweird.f32 %v1126_v36  ;;  %v284_v12 = vpop.permute.xlu2 %283 }
 0x229   :  { %1127 = vrsqrt.f32 %v719_v37  ;;  %vm659_vm6 = vmor %vm657_vm5, %vm658_vm4  ;;  %vm727_vm8 = vweird.f32 %v719_v37  ;;  %v288_v3 = vsub.f32 %v1356_v27, %v284_v12 }
 0x22a   :  { %v653_v19 = vmul.f32 %v1126_v36, %v652_v39  ;;  %291 = vrot.lane.b32.xlu2 %v287_v38, %s1136_s4  ;;  %v650_v56 = vsel %vm649_vm3, %v1124_v11, %v646_v40 }
 0x22b   :  { %v661_v42 = vmul.f32 %v650_v56, %v1344_v0 }
 0x22c   :  { %v654_v43 = vmul.f32 0.5, %v653_v19 }
 0x22d   :  { %v663_v44 = vmul.f32 %v661_v42, %v629_v41 }
 0x22e   :  { %v655_v45 = vsub.f32 1.5, %v654_v43 }
 0x22f   :  { %v1128_v48 = vpop.eup %1127  ;;  %667 = vrot.lane.b32.xlu0 %v663_v44, %s1135_s21 }
 0x230   :  { %v722_v49 = vmul.f32 %v1128_v48, %v719_v37  ;;  %v656_v51 = vmul.f32 %v1126_v36, %v655_v45  ;;  %vm728_vm7 = vweird.f32 %v1128_v48 }
 0x231   :  { %vm729_vm9 = vmor %vm727_vm8, %vm728_vm7 }
 0x232   :  { %v723_v52 = vmul.f32 %v1128_v48, %v722_v49  ;;  %v660_v53 = vsel %vm659_vm6, %v1126_v36, %v656_v51 }
 0x233   :  { %v662_v57 = vmul.f32 %v660_v53, %v1356_v27 }
 0x234   :  { %v724_v59 = vmul.f32 0.5, %v723_v52 }
 0x235   :  { %v664_v63 = vmul.f32 %v662_v57, %v630_v54  ;;  %v1137_v54 = vmov 4  }
 0x236   :  { %v725_v1 = vsub.f32 1.5, %v724_v59  ;;  %1102 = vset.pattern.permute.xlu2 %v1137_v54  ;;  %1103 = vset.pattern.permute.xlu1 %v1137_v54 }
 0x237   :  { %669 = vrot.lane.b32.xlu1 %v664_v63, %s1135_s21 }
 0x238   :  { %v726_v41 = vmul.f32 %v1128_v48, %v725_v1 }
 0x23a   :  { %v730_v47 = vsel %vm729_vm9, %v1128_v48, %v726_v41 }
 0x23b   :  { %v741_v23 = vmul.f32 %v730_v47, %v1344_v0 }
 0x23d   :  { %v743_v7 = vmul.f32 %v741_v23, %v711_v18 }
 0x23f   :  { %747 = vrot.lane.b32.xlu0 %v743_v7, %s1135_s21  ;;  %213 = vrot.lane.b32.xlu1 %v1351_v20, %s1135_s21 }
 0x247   :  { %215 = vrot.lane.b32.xlu0 %v1363_v34, %s1135_s21  ;;  %293 = vrot.lane.b32.xlu1 %v288_v3, %s1136_s4 }
 0x27c   :  { %v750_v18 = vpop.permute.xlu2 %749 }
 0x27d   :  { %v754_v24 = vsub.f32 %v1356_v27, %v750_v18 }
 0x284   :  { %v292_v28 = vpop.permute.xlu2 %291 }
 0x2a1   :  { %v668_v5 = vpop.permute.xlu0 %667 }
 0x2a2   :  { %v673_v11 = vsub.f32 %v1344_v0, %v668_v5 }
 0x2a4   :  { %677 = vrot.lane.b32.xlu0 %v673_v11, %s1139_s16 }
 0x2a9   :  { %v670_v20 = vpop.permute.xlu1 %669 }
 0x2aa   :  { %v674_v10 = vsub.f32 %v1356_v27, %v670_v20 }
 0x2ac   :  { %759 = vrot.lane.b32.xlu0 %v754_v24, %s1140_s17  ;;  %679 = vrot.lane.b32.xlu2 %v674_v10, %s1139_s16 }
 0x2b1   :  { %v748_v34 = vpop.permute.xlu0 %747  ;;  %v214_v15 = vpop.permute.xlu1 %213 }
 0x2b2   :  { %v753_v25 = vsub.f32 %v1344_v0, %v748_v34  ;;  %v219_v39 = vsub.f32 %v1344_v0, %v214_v15 }
 0x2b4   :  { %767 = vperm.xlu0 %1104, %v741_v23   ;;  %687 = vperm.xlu2 %1102, %v661_v42   ;;  %v297_v40 = vadd.f32 %v292_v28, %v219_v39  ;;  %v382_v42 = vpop.f32.mrf.mxu2 }
 0x2b5   :  { %757 = vrot.lane.b32.xlu1 %v753_v25, %s1140_s17 }
 0x2b9   :  { %v216_v26 = vpop.permute.xlu0 %215  ;;  %v294_v30 = vpop.permute.xlu1 %293 }
 0x2ba   :  { %v220_v29 = vsub.f32 %v1356_v27, %v216_v26 }
 0x2bc   :  { %1105 = vset.pattern.permute.xlu2 %v1138_v4  ;;  %v298_v35 = vadd.f32 %v294_v30, %v220_v29  ;;  %v384_v43 = vpop.f32.mrf.mxu2 }
 0x2bd   :  { %692 = vperm.xlu1 %1103, %v662_v57   ;;  %772 = vperm.xlu2 %1105, %v1504_v6  }
 0x2c4   :  { %v387_v44 = vpop.f32.mrf.mxu2 }
 0x2c5   :  { %1107 = vset.pattern.permute.xlu2 %v1141_v62  ;;  %1106 = vset.pattern.permute.xlu1 %v1141_v62 }
 0x2cc   :  { %v389_v45 = vpop.f32.mrf.mxu2 }
 0x2d4   :  { %v401_v48 = vpop.f32.mrf.mxu2 }
 0x2dc   :  { %v403_v49 = vpop.f32.mrf.mxu2 }
 0x2e4   :  { %v406_v54 = vpop.f32.mrf.mxu2 }
 0x306   :  { %v680_v31 = vpop.permute.xlu2 %679 }
 0x307   :  { %v684_v36 = vadd.f32 %v680_v31, %v298_v35  ;;  %v408_v31 = vpop.f32.mrf.mxu2 }
 0x30e   :  { %v688_v27 = vpop.permute.xlu2 %687 }
 0x30f   :  { %v695_v23 = vmul.f32 %v688_v27, %v1337_v55  ;;  %v696_v7 = vmul.f32 %v688_v27, %v1339_v58  ;;  %v699_v12 = vmul.f32 %v688_v27, %v1359_v32  ;;  %v700_v3 = vmul.f32 %v688_v27, %v1361_v33 }
 0x316   :  { %v678_v2 = vpop.permute.xlu0 %677 }
 0x317   :  { %v683_v6 = vadd.f32 %v678_v2, %v297_v40  ;;  %v773_v53 = vpop.permute.xlu2 %772 }
 0x318   :  { %v785_v58 = vmul.f32 %v773_v53, %v1393_v21  ;;  %v786_v32 = vmul.f32 %v773_v53, %v1395_v22 }
 0x31e   :  { %v760_v37 = vpop.permute.xlu0 %759 }
 0x31f   :  { %v764_v38 = vadd.f32 %v760_v37, %v684_v36 }
 0x321   :  { %832 = vperm.xlu2 %1107, %v764_v38  }
 0x326   :  { %v768_v51 = vpop.permute.xlu0 %767 }
 0x327   :  { %v758_v19 = vpop.permute.xlu1 %757  ;;  %v775_v57 = vmul.f32 %v768_v51, %v1372_v60  ;;  %v776_v59 = vmul.f32 %v768_v51, %v1374_v61  ;;  %v783_v63 = vmul.f32 %v768_v51, %v1387_v13  ;;  %v784_v1 = vmul.f32 %v768_v51, %v1389_v17 }
 0x328   :  { %v763_v56 = vadd.f32 %v758_v19, %v683_v6  ;;  %v777_v60 = vmul.f32 %v773_v53, %v1379_v8  ;;  %v778_v61 = vmul.f32 %v773_v53, %v1381_v9 }
 0x329   :  { %v779_v13 = vadd.f32 %v775_v57, %v695_v23  ;;  %v780_v4 = vadd.f32 %v776_v59, %v696_v7  ;;  %v787_v17 = vadd.f32 %v783_v63, %v699_v12  ;;  %v788_v5 = vadd.f32 %v784_v1, %v700_v3 }
 0x32a   :  { %827 = vperm.xlu1 %1106, %v763_v56   ;;  %v1142_v59 = vmov 8  }
 0x32b   :  { %v799_v33 = vadd.f32 %v779_v13, %v382_v42  ;;  %v800_v18 = vadd.f32 %v780_v4, %v401_v48  ;;  %v803_v20 = vadd.f32 %v787_v17, %v387_v44  ;;  %v804_v8 = vadd.f32 %v788_v5, %v406_v54  ;;  %1108 = vset.pattern.permute.xlu0 %v1142_v59 }
 0x32c   :  { %1109 = vset.pattern.permute.xlu2 %v1142_v59 }
 0x32f   :  { %v693_v52 = vpop.permute.xlu1 %692 }
 0x330   :  { %v697_v41 = vmul.f32 %v693_v52, %v1347_v14  ;;  %v698_v47 = vmul.f32 %v693_v52, %v1349_v16  ;;  %v701_v14 = vmul.f32 %v693_v52, %v1365_v50  ;;  %v702_v16 = vmul.f32 %v693_v52, %v1367_v46 }
 0x332   :  { %v781_v55 = vadd.f32 %v777_v60, %v697_v41  ;;  %v782_v11 = vadd.f32 %v778_v61, %v698_v47  ;;  %v789_v9 = vadd.f32 %v785_v58, %v701_v14  ;;  %v790_v10 = vadd.f32 %v786_v32, %v702_v16 }
 0x334   :  { %v801_v34 = vadd.f32 %v781_v55, %v384_v43  ;;  %v802_v25 = vadd.f32 %v782_v11, %v403_v49  ;;  %v805_v35 = vadd.f32 %v789_v9, %v389_v45  ;;  %v806_v36 = vadd.f32 %v790_v10, %v408_v31 }
 0x37b   :  { %v833_v24 = vpop.permute.xlu2 %832 }
 0x37c   :  { %v1553_v21 = vadd.f32 %v833_v24, %v801_v34  ;;  %v1555_v22 = vadd.f32 %v833_v24, %v802_v25  ;;  %v1565_v38 = vadd.f32 %v833_v24, %v805_v35  ;;  %v1567_v39 = vadd.f32 %v833_v24, %v806_v36 }
 0x37d   :  { %v1143_v36 = vmov 9  }
 0x37e   :  { %v865_v40 = vmul.f32 %v1553_v21, %v1553_v21  ;;  %v866_v6 = vmul.f32 %v1555_v22, %v1555_v22  ;;  %v860_v56 = vadd.f32 %v1567_v39, %v1565_v38  ;;  %v854_v42 = vadd.f32 %v1555_v22, %v1553_v21  ;;  %1110 = vset.pattern.permute.xlu1 %v1143_v36 }
 0x37f   :  { %v869_v45 = vmul.f32 %v1565_v38, %v1565_v38  ;;  %v870_v48 = vmul.f32 %v1567_v39, %v1567_v39 }
 0x380   :  { %v874_v19 = vadd.f32 %v866_v6, %v865_v40 }
 0x381   :  { %v880_v49 = vadd.f32 %v870_v48, %v869_v45 }
 0x39c   :  { %v828_v62 = vpop.permute.xlu1 %827 }
 0x39d   :  { %v1545_v26 = vadd.f32 %v828_v62, %v799_v33  ;;  %v1547_v50 = vadd.f32 %v828_v62, %v800_v18  ;;  %v1549_v46 = vadd.f32 %v828_v62, %v803_v20  ;;  %v1551_v15 = vadd.f32 %v828_v62, %v804_v8  ;;  %v816_v62 = vld [vmem:[%s1630_s0 + $0x8] sm:$0xff] }
 0x39f   :  { %v857_v28 = vadd.f32 %v1551_v15, %v1549_v46  ;;  %v851_v2 = vadd.f32 %v1547_v50, %v1545_v26  ;;  %v863_v29 = vmul.f32 %v1545_v26, %v1545_v26  ;;  %v864_v30 = vmul.f32 %v1547_v50, %v1547_v50 }
 0x3a0   :  { %v867_v43 = vmul.f32 %v1549_v46, %v1549_v46  ;;  %v868_v44 = vmul.f32 %v1551_v15, %v1551_v15 }
 0x3a1   :  { %858 = vadd.xlane.f32.xlu2 %v857_v28  ;;  %852 = vadd.xlane.f32.xlu1 %v851_v2  ;;  %v871_v37 = vadd.f32 %v864_v30, %v863_v29 }
 0x3a2   :  { %v877_v27 = vadd.f32 %v868_v44, %v867_v43 }
 0x3a3   :  { %872 = vadd.xlane.f32.xlu0 %v871_v37 }
 0x3a9   :  { %875 = vadd.xlane.f32.xlu2 %v874_v19  ;;  %861 = vadd.xlane.f32.xlu1 %v860_v56 }
 0x3ab   :  { %855 = vadd.xlane.f32.xlu0 %v854_v42 }
 0x3b1   :  { %878 = vadd.xlane.f32.xlu1 %v877_v27 }
 0x3b3   :  { %881 = vadd.xlane.f32.xlu0 %v880_v49 }
 0x414   :  { %v853_v51 = vpop.xlane.xlu1 %852  ;;  %v859_v53 = vpop.xlane.xlu2 %858 }
 0x415   :  { %v887_v1 = vadd.f32 %v859_v53, %v853_v51 }
 0x416   :  { %v873_v52 = vpop.xlane.xlu0 %872 }
 0x417   :  { %v891_v47 = vmul.f32 0.001953125, %v887_v1 }
 0x419   :  { %v895_v60 = vmul.f32 %v891_v47, %v891_v47 }
 0x41c   :  { %v862_v57 = vpop.xlane.xlu1 %861  ;;  %v876_v3 = vpop.xlane.xlu2 %875 }
 0x41e   :  { %v856_v63 = vpop.xlane.xlu0 %855 }
 0x41f   :  { %v888_v41 = vadd.f32 %v862_v57, %v856_v63 }
 0x421   :  { %v892_v7 = vmul.f32 0.001953125, %v888_v41 }
 0x423   :  { %v896_v4 = vmul.f32 %v892_v7, %v892_v7 }
 0x424   :  { %v879_v23 = vpop.xlane.xlu1 %878 }
 0x425   :  { %v889_v12 = vadd.f32 %v879_v23, %v873_v52 }
 0x426   :  { %v882_v54 = vpop.xlane.xlu0 %881 }
 0x427   :  { %v893_v61 = vmul.f32 0.001953125, %v889_v12  ;;  %v890_v13 = vadd.f32 %v882_v54, %v876_v3 }
 0x429   :  { %v897_v17 = vsub.f32 %v893_v61, %v895_v60  ;;  %v894_v5 = vmul.f32 0.001953125, %v890_v13 }
 0x42b   :  { %v899_v14 = vadd.f32 1e-05, %v897_v17  ;;  %v898_v16 = vsub.f32 %v894_v5, %v896_v4 }
 0x42d   :  { %1129 = vrsqrt.f32 %v899_v14  ;;  %v900_v55 = vadd.f32 1e-05, %v898_v16  ;;  %vm907_vm11 = vweird.f32 %v899_v14 }
 0x42f   :  { %1131 = vrsqrt.f32 %v900_v55  ;;  %vm917_vm14 = vweird.f32 %v900_v55 }
 0x433   :  { %v1130_v11 = vpop.eup %1129 }
 0x434   :  { %v902_v58 = vmul.f32 %v1130_v11, %v899_v14  ;;  %vm908_vm10 = vweird.f32 %v1130_v11 }
 0x435   :  { %v1132_v32 = vpop.eup %1131  ;;  %vm909_vm13 = vmor %vm907_vm11, %vm908_vm10 }
 0x436   :  { %v903_v33 = vmul.f32 %v1130_v11, %v902_v58  ;;  %v912_v18 = vmul.f32 %v1132_v32, %v900_v55  ;;  %vm918_vm12 = vweird.f32 %v1132_v32 }
 0x437   :  { %vm919_vm15 = vmor %vm917_vm14, %vm918_vm12 }
 0x438   :  { %v904_v20 = vmul.f32 0.5, %v903_v33  ;;  %v913_v8 = vmul.f32 %v1132_v32, %v912_v18 }
 0x43a   :  { %v905_v24 = vsub.f32 1.5, %v904_v20  ;;  %v914_v9 = vmul.f32 0.5, %v913_v8 }
 0x43c   :  { %v915_v10 = vsub.f32 1.5, %v914_v9  ;;  %v906_v34 = vmul.f32 %v1130_v11, %v905_v24 }
 0x43e   :  { %v910_v25 = vsel %vm909_vm13, %v1130_v11, %v906_v34  ;;  %v916_v28 = vmul.f32 %v1132_v32, %v915_v10 }
 0x43f   :  { %v921_v2 = vmul.f32 %v910_v25, %v1344_v0 }
 0x440   :  { %v920_v29 = vsel %vm919_vm15, %v1132_v32, %v916_v28 }
 0x441   :  { %945 = vperm.xlu0 %1108, %v921_v2   ;;  %v923_v30 = vmul.f32 %v921_v2, %v891_v47  ;;  %v922_v31 = vmul.f32 %v920_v29, %v816_v62 }
 0x443   :  { %927 = vrot.lane.b32.xlu2 %v923_v30, %s1135_s21  ;;  %v924_v35 = vmul.f32 %v922_v31, %v892_v7 }
 0x445   :  { %929 = vrot.lane.b32.xlu1 %v924_v35, %s1135_s21 }
 0x449   :  { %1112 = vset.pattern.permute.xlu0 %v1143_v36 }
 0x44b   :  { %950 = vperm.xlu2 %1109, %v922_v31  }
 0x453   :  { %1111 = vset.pattern.permute.xlu2 %v1143_v36 }
 0x49d   :  { %v928_v37 = vpop.permute.xlu2 %927 }
 0x49e   :  { %v933_v40 = vsub.f32 %v1344_v0, %v928_v37 }
 0x4a0   :  { %963 = vperm.xlu1 %1110, %v933_v40  }
 0x4a5   :  { %v951_v56 = vpop.permute.xlu2 %950 }
 0x4a6   :  { %v955_v0 = vmul.f32 %v951_v56, %v1553_v21  ;;  %v956_v57 = vmul.f32 %v951_v56, %v1555_v22 }
 0x4b3   :  { %v946_v42 = vpop.permute.xlu0 %945 }
 0x4b4   :  { %v953_v43 = vmul.f32 %v946_v42, %v1545_v26  ;;  %v954_v44 = vmul.f32 %v946_v42, %v1547_v50  ;;  %v957_v45 = vmul.f32 %v946_v42, %v1549_v46  ;;  %v958_v48 = vmul.f32 %v946_v42, %v1551_v15 }
 0x4b5   :  { %v959_v26 = vmul.f32 %v951_v56, %v1565_v38  ;;  %v960_v46 = vmul.f32 %v951_v56, %v1567_v39 }
 0x4b7   :  { %v930_v6 = vpop.permute.xlu1 %929 }
 0x4b8   :  { %v934_v19 = vsub.f32 %v816_v62, %v930_v6 }
 0x4ba   :  { %968 = vperm.xlu2 %1111, %v934_v19  }
 0x512   :  { %v964_v27 = vpop.permute.xlu1 %963 }
 0x513   :  { %v971_v49 = vadd.f32 %v964_v27, %v953_v43  ;;  %v972_v51 = vadd.f32 %v964_v27, %v954_v44  ;;  %v975_v52 = vadd.f32 %v964_v27, %v957_v45  ;;  %v976_v53 = vadd.f32 %v964_v27, %v958_v48 }
 0x514   :  { %v969_v59 = vpop.permute.xlu2 %968 }
 0x515   :  { %979 = vst [vmem:[%s1632_s8] sm:$0xff] %v971_v49  ;;  %v973_v50 = vadd.f32 %v969_v59, %v955_v0  ;;  %v974_v15 = vadd.f32 %v969_v59, %v956_v57  ;;  %v977_v21 = vadd.f32 %v969_v59, %v959_v26  ;;  %v978_v22 = vadd.f32 %v969_v59, %v960_v46 }
 0x516   :  { %980 = vst [vmem:[%s1632_s8 + $0x8] sm:$0xff] %v972_v51 }
 0x517   :  { %983 = vst [vmem:[%s1632_s8 + $0x20] sm:$0xff] %v975_v52 }
 0x518   :  { %984 = vst [vmem:[%s1632_s8 + $0x28] sm:$0xff] %v976_v53 }
 0x519   :  { %981 = vst [vmem:[%s1632_s8 + $0x10] sm:$0xff] %v973_v50 }
 0x51a   :  { %982 = vst [vmem:[%s1632_s8 + $0x18] sm:$0xff] %v974_v15 }
 0x51b   :  { %985 = vst [vmem:[%s1632_s8 + $0x30] sm:$0xff] %v977_v21 }
 0x51c   :  { %986 = vst [vmem:[%s1632_s8 + $0x38] sm:$0xff] %v978_v22 }

</bundles_post_ra>
